<compile_context>
chip_gen: v5e
topology: v5e:2x2
jax: 0.10.0
libtpu: 0.0.40
codegen_flags: <defaults>
</compile_context>

<pallas_src>
import jax
import jax.numpy as jnp
from jax import lax
from jax.experimental import pallas as pl
from jax.experimental.pallas import tpu as pltpu

EPS = 1e-5


def _round_up(x, m):
    return ((x + m - 1) // m) * m


def _lane_shift(x, d, m):
    """result[:, p] = x[:, (p + d) % m] for static d (two lane slices + concat)."""
    d = d % m
    if d == 0:
        return x
    return jnp.concatenate([x[:, d:], x[:, :d]], axis=1)


# ---------------------------------- kernel ----------------------------------
def _make_kernel(H, W, Ce, Cd, Co, B, Lr):
    Wp = W + 2
    M = B * Lr  # lanes per grid step (multiple of 128)

    def kernel(x1p_ref, x2p_ref, wtab_ref, vtab_ref, mtab_ref, out_ref):
        # ---- unpack packed parameter tables (few BlockSpecs, few DMAs) ----
        enc_scale = vtab_ref[:Ce, 0:1]
        enc_bias = vtab_ref[:Ce, 1:2]
        dec_scale = vtab_ref[:Cd, 2:3]
        dec_bias = vtab_ref[:Cd, 3:4]
        b_enc = vtab_ref[:Co, 4:5]
        b_dec = vtab_ref[:Co, 5:6]
        attn_scale = vtab_ref[:Co, 6:7]
        attn_bias = vtab_ref[:Co, 7:8]
        w_attn = vtab_ref[:Co, 8:9]
        b_attn = vtab_ref[0:1, 9:10]
        w_e = wtab_ref[:, :9 * Ce]            # (Co, 9*Ce), columns (ky,kx,ci)
        w_d = wtab_ref[:, 9 * Ce:]            # (Co, 9*Cd)

        # ---- encoder branch: BN -> ReLU (+ halo re-zero) on 4 parity planes ----
        act_planes = []
        for par in range(4):                                   # par = 2*ar + br
            xpl = x1p_ref[par]                                 # (Ce, M) lane-dense
            act = jnp.maximum(xpl * enc_scale + enc_bias, 0.0)
            act_planes.append(act * mtab_ref[par:par + 1, :])  # re-zero conv halo

        # 16 shifted plane views cover all 36 (pool-phase, tap) reads
        shifted = {}
        for ar in range(2):
            for br in range(2):
                base = act_planes[2 * ar + br]
                for ah in range(2):
                    for bh in range(2):
                        shifted[(ar, br, ah, bh)] = _lane_shift(base, ah * Wp + bh, M)

        # conv3x3 + 2x2 maxpool == max over 4 pool-phase im2col matmuls,
        # each already aligned to the decoder's flat indexing.
        epool = None
        for di in range(2):
            for dj in range(2):
                taps = []
                for ky in range(3):
                    for kx in range(3):
                        a_, b_ = di + ky, dj + kx
                        taps.append(shifted[(a_ % 2, b_ % 2, a_ // 2, b_ // 2)])
                patches = jnp.concatenate(taps, axis=0)        # (9*Ce, M)
                ph = jnp.dot(w_e, patches, preferred_element_type=jnp.float32)
                epool = ph if epool is None else jnp.maximum(epool, ph)   # (Co, M)

        # ---- decoder branch: BN -> ReLU (+ halo re-zero) -> conv3x3 (one matmul) ----
        x2raw = x2p_ref[...]                                   # (Cd, M), raw padded x2
        actd = jnp.maximum(x2raw * dec_scale + dec_bias, 0.0) * mtab_ref[4:5, :]
        taps_d = [_lane_shift(actd, (ky - 1) * Wp + (kx - 1), M)
                  for ky in range(3) for kx in range(3)]
        patches_d = jnp.concatenate(taps_d, axis=0)            # (9*Cd, M)
        dconv = jnp.dot(w_d, patches_d, preferred_element_type=jnp.float32)

        # ---- attention head: add -> BN -> ReLU -> 1x1 conv (sublane reduce) ----
        s = epool + dconv + (b_enc + b_dec)                    # (Co, M)
        attn_act = jnp.maximum(s * attn_scale + attn_bias, 0.0)
        attn = jnp.sum(attn_act * w_attn, axis=0, keepdims=True) + b_attn   # (1, M)

        # ---- gate: attn * raw x2; halo/tail lanes of x2p are 0 -> output 0 there ----
        out_ref[...] = (attn * x2raw).astype(out_ref.dtype)    # (Cd, M), lane-dense store

    return kernel


# --------------------------------- wrapper -----------------------------------
def _fold_bn(gamma, beta, mean, var):
    scale = gamma / jnp.sqrt(var + EPS)
    bias = beta - mean * scale
    return scale.astype(jnp.float32), bias.astype(jnp.float32)


def attention_block(x1_nchw, x2_nchw, p, *, batch_block=2):
    N, Ce, H2, W2 = x1_nchw.shape
    _, Cd, H, W = x2_nchw.shape
    Co = p["w_enc"].shape[0]
    assert H2 == 2 * H and W2 == 2 * W
    assert N % batch_block == 0
    B = batch_block
    Hp, Wp = H + 2, W + 2
    Lr = _round_up(Hp * Wp, 128)          # per-sample flat length, lane-aligned
    M = B * Lr

    x1 = x1_nchw.astype(jnp.float32)
    x2 = x2_nchw.astype(jnp.float32)

    # decoder input: zero-pad, flatten padded spatial per sample, fold batch into lanes
    x2p = jnp.pad(x2, ((0, 0), (0, 0), (1, 1), (1, 1)))                  # (N, Cd, Hp, Wp)
    x2f = jnp.pad(x2p.reshape(N, Cd, Hp * Wp), ((0, 0), (0, 0), (0, Lr - Hp * Wp)))
    x2f = jnp.transpose(x2f, (1, 0, 2)).reshape(Cd, N * Lr)

    # encoder input: zero-pad, split into 4 parity planes embedded in the decoder grid
    x1p = jnp.pad(x1, ((0, 0), (0, 0), (1, 1), (1, 1)))                  # (N, Ce, 2H+2, 2W+2)
    planes = []
    for ar in range(2):
        for br in range(2):
            q = x1p[:, :, ar::2, br::2]                                  # (N, Ce, H+1, W+1)
            q = jnp.pad(q, ((0, 0), (0, 0), (1, 0), (1, 0)))             # embed at (1,1)
            planes.append(q)                                             # (N, Ce, Hp, Wp)
    x1pl = jnp.stack(planes, 0).reshape(4, N, Ce, Hp * Wp)
    x1pl = jnp.pad(x1pl, ((0, 0), (0, 0), (0, 0), (0, Lr - Hp * Wp)))
    x1pl = jnp.transpose(x1pl, (0, 2, 1, 3)).reshape(4, Ce, N * Lr)

    # packed weight table (Co, 9*Ce + 9*Cd), columns ordered (ky, kx, ci)
    w_e = jnp.transpose(p["w_enc"], (0, 2, 3, 1)).reshape(Co, 9 * Ce).astype(jnp.float32)
    w_d = jnp.transpose(p["w_dec"], (0, 2, 3, 1)).reshape(Co, 9 * Cd).astype(jnp.float32)
    wtab = jnp.concatenate([w_e, w_d], axis=1)

    # packed per-channel vector table (Cmax, 10): column j holds vector j (sublane-major)
    enc_s, enc_b = _fold_bn(p["bn_e_g"], p["bn_e_b"], p["bn_e_m"], p["bn_e_v"])
    dec_s, dec_b = _fold_bn(p["bn_d_g"], p["bn_d_b"], p["bn_d_m"], p["bn_d_v"])
    att_s, att_b = _fold_bn(p["bn_a_g"], p["bn_a_b"], p["bn_a_m"], p["bn_a_v"])
    Cmax = max(Ce, Cd, Co, 8)

    def col(v):
        v = jnp.asarray(v, jnp.float32).reshape(-1)
        return jnp.pad(v, (0, Cmax - v.shape[0]))

    vtab = jnp.stack([col(enc_s), col(enc_b), col(dec_s), col(dec_b),
                      col(p["b_enc"]), col(p["b_dec"]), col(att_s), col(att_b),
                      col(p["w_attn"].reshape(-1)), col(p["b_attn"])], axis=1)

    # mask table (5, N*Lr): 4 encoder-plane halo masks + decoder interior mask
    rr = jnp.arange(Hp)[:, None]
    cc = jnp.arange(Wp)[None, :]

    def flat_tile(m2d):
        v = jnp.pad(m2d.astype(jnp.float32).reshape(-1), (0, Lr - Hp * Wp))
        return jnp.tile(v, N)

    mrows = []
    for ar in range(2):
        for br in range(2):
            m = ((rr >= 2 - ar) & (rr <= H + 1 - ar) &
                 (cc >= 2 - br) & (cc <= W + 1 - br))
            mrows.append(flat_tile(m))
    mrows.append(flat_tile((rr >= 1) & (rr <= H) & (cc >= 1) & (cc <= W)))
    mtab = jnp.stack(mrows, axis=0)

    kernel = _make_kernel(H, W, Ce, Cd, Co, B, Lr)

    grid_spec = pltpu.PrefetchScalarGridSpec(
        num_scalar_prefetch=0,
        grid=(N // B,),
        in_specs=[
            pl.BlockSpec((4, Ce, M), lambda n: (0, 0, n)),     # x1 parity planes
            pl.BlockSpec((Cd, M), lambda n: (0, n)),           # x2 padded (raw, BN'd in-kernel)
            pl.BlockSpec((Co, 9 * Ce + 9 * Cd), lambda n: (0, 0)),
            pl.BlockSpec((Cmax, 10), lambda n: (0, 0)),
            pl.BlockSpec((5, M), lambda n: (0, n)),            # halo masks
        ],
        out_specs=pl.BlockSpec((Cd, M), lambda n: (0, n)),
    )

    out_flat = pl.pallas_call(
        kernel,
        out_shape=jax.ShapeDtypeStruct((Cd, N * Lr), jnp.float32),
        grid_spec=grid_spec,
        compiler_params=pltpu.CompilerParams(
            dimension_semantics=("parallel",),     # batch blocks are independent
            vmem_limit_bytes=32 * 1024 * 1024,     # safe on v5e/v6e/v7x; footprint is tiny
        ),
    )(x1pl, x2f, wtab, vtab, mtab)

    # un-fold lanes -> NCHW interior (wrapper-side slices / reshapes only)
    out = out_flat.reshape(Cd, N, Lr)[:, :, :Hp * Wp].reshape(Cd, N, Hp, Wp)
    out = out[:, :, 1:H + 1, 1:W + 1]
    return jnp.transpose(out, (1, 0, 2, 3))


# ----------------------------- pure-JAX reference -----------------------------
def reference_forward(x1, x2, p):
    def bn(x, g, b, m, v):
        g, b, m, v = (t[None, :, None, None] for t in (g, b, m, v))
        return (x - m) / jnp.sqrt(v + EPS) * g + b

    def conv(x, w, b):
        y = jax.lax.conv_general_dilated(
            x, w, (1, 1), "SAME", dimension_numbers=("NCHW", "OIHW", "NCHW"))
        return y + b[None, :, None, None]

    e = jax.nn.relu(bn(x1, p["bn_e_g"], p["bn_e_b"], p["bn_e_m"], p["bn_e_v"]))
    e = conv(e, p["w_enc"], p["b_enc"])
    e = jax.lax.reduce_window(e, -jnp.inf, jax.lax.max,
                              (1, 1, 2, 2), (1, 1, 2, 2), "VALID")
    d = jax.nn.relu(bn(x2, p["bn_d_g"], p["bn_d_b"], p["bn_d_m"], p["bn_d_v"]))
    d = conv(d, p["w_dec"], p["b_dec"])
    out = e + d
    a = jax.nn.relu(bn(out, p["bn_a_g"], p["bn_a_b"], p["bn_a_m"], p["bn_a_v"]))
    a = conv(a, p["w_attn"], p["b_attn"])
    return a * x2


def make_params(key, Ce, Cd, Co):
    ks = jax.random.split(key, 18)
    u = lambda k, s, lo, hi: jax.random.uniform(k, s, jnp.float32, lo, hi)
    n = lambda k, s, sc: sc * jax.random.normal(k, s, jnp.float32)
    return dict(
        w_enc=n(ks[0], (Co, Ce, 3, 3), 1.0 / (3.0 * jnp.sqrt(float(Ce)))),
        b_enc=n(ks[1], (Co,), 0.02),
        w_dec=n(ks[2], (Co, Cd, 3, 3), 1.0 / (3.0 * jnp.sqrt(float(Cd)))),
        b_dec=n(ks[3], (Co,), 0.02),
        w_attn=n(ks[4], (1, Co, 1, 1), 1.0 / jnp.sqrt(float(Co))),
        b_attn=n(ks[5], (1,), 0.02),
        bn_e_g=u(ks[6], (Ce,), 0.5, 1.5), bn_e_b=n(ks[7], (Ce,), 0.1),
        bn_e_m=n(ks[8], (Ce,), 0.1), bn_e_v=u(ks[9], (Ce,), 0.5, 1.5),
        bn_d_g=u(ks[10], (Cd,), 0.5, 1.5), bn_d_b=n(ks[11], (Cd,), 0.1),
        bn_d_m=n(ks[12], (Cd,), 0.1), bn_d_v=u(ks[13], (Cd,), 0.5, 1.5),
        bn_a_g=u(ks[14], (Co,), 0.5, 1.5), bn_a_b=n(ks[15], (Co,), 0.1),
        bn_a_m=n(ks[16], (Co,), 0.1), bn_a_v=u(ks[17], (Co,), 0.5, 1.5),
    )


if __name__ == "__main__":
    N, Ce, Cd, Co = 4, 4, 8, 6
    H, W = 8, 8                       # x2 (decoder) spatial; x1 is 2x larger
    key = jax.random.PRNGKey(0)
    k1, k2, kp = jax.random.split(key, 3)

    x1 = jax.random.normal(k1, (N, Ce, 2 * H, 2 * W), jnp.float32)   # NCHW
    x2 = jax.random.normal(k2, (N, Cd, H, W), jnp.float32)           # NCHW
    params = make_params(kp, Ce, Cd, Co)

    out = jax.block_until_ready(attention_block(x1, x2, params, batch_block=2))
    ref = jax.block_until_ready(reference_forward(x1, x2, params))

    assert out.shape == (N, Cd, H, W), out.shape
    assert bool(jnp.allclose(out, ref, rtol=1e-4, atol=1e-4)), \
        f"max abs err {float(jnp.max(jnp.abs(out - ref)))}"

    print("KERNEL_OK")
</pallas_src>

<mosaic_0001>
module attributes {stable_mosaic.version = 11 : i64} {
  func.func @kernel(%arg0: i32, %arg1: memref<4x4x256xf32, #tpu.memory_space<vmem>>, %arg2: memref<8x256xf32, #tpu.memory_space<vmem>>, %arg3: memref<6x108xf32, #tpu.memory_space<vmem>>, %arg4: memref<8x10xf32, #tpu.memory_space<vmem>>, %arg5: memref<5x256xf32, #tpu.memory_space<vmem>>, %arg6: memref<8x256xf32, #tpu.memory_space<vmem>>) attributes {dimension_semantics = [#tpu.dimension_semantics<parallel>], iteration_bounds = array<i64: 2>, scalar_prefetch = 0 : i64, scratch_operands = 0 : i64, tpu.core_type = #tpu.core_type<tc>, window_params = [{transform_indices = @transform_0, window_bounds = array<i64: 4, 4, 256>}, {transform_indices = @transform_1, window_bounds = array<i64: 8, 256>}, {pipeline_mode = #tpu.pipeline_mode<synchronous>, transform_indices = @transform_2, window_bounds = array<i64: 6, 108>}, {pipeline_mode = #tpu.pipeline_mode<synchronous>, transform_indices = @transform_3, window_bounds = array<i64: 8, 10>}, {transform_indices = @transform_4, window_bounds = array<i64: 5, 256>}, {transform_indices = @transform_5, window_bounds = array<i64: 8, 256>}]} {
    %c0 = arith.constant 0 : index
    %c0_0 = arith.constant 0 : index
    %0 = vector.load %arg4[%c0, %c0_0] : memref<8x10xf32, #tpu.memory_space<vmem>>, vector<4x1xf32>
    %c0_1 = arith.constant 0 : index
    %c1 = arith.constant 1 : index
    %1 = vector.load %arg4[%c0_1, %c1] : memref<8x10xf32, #tpu.memory_space<vmem>>, vector<4x1xf32>
    %c0_2 = arith.constant 0 : index
    %c2 = arith.constant 2 : index
    %2 = vector.load %arg4[%c0_2, %c2] : memref<8x10xf32, #tpu.memory_space<vmem>>, vector<8x1xf32>
    %c0_3 = arith.constant 0 : index
    %c3 = arith.constant 3 : index
    %3 = vector.load %arg4[%c0_3, %c3] : memref<8x10xf32, #tpu.memory_space<vmem>>, vector<8x1xf32>
    %c0_4 = arith.constant 0 : index
    %c4 = arith.constant 4 : index
    %4 = vector.load %arg4[%c0_4, %c4] : memref<8x10xf32, #tpu.memory_space<vmem>>, vector<6x1xf32>
    %c0_5 = arith.constant 0 : index
    %c5 = arith.constant 5 : index
    %5 = vector.load %arg4[%c0_5, %c5] : memref<8x10xf32, #tpu.memory_space<vmem>>, vector<6x1xf32>
    %c0_6 = arith.constant 0 : index
    %c6 = arith.constant 6 : index
    %6 = vector.load %arg4[%c0_6, %c6] : memref<8x10xf32, #tpu.memory_space<vmem>>, vector<6x1xf32>
    %c0_7 = arith.constant 0 : index
    %c7 = arith.constant 7 : index
    %7 = vector.load %arg4[%c0_7, %c7] : memref<8x10xf32, #tpu.memory_space<vmem>>, vector<6x1xf32>
    %c0_8 = arith.constant 0 : index
    %c8 = arith.constant 8 : index
    %8 = vector.load %arg4[%c0_8, %c8] : memref<8x10xf32, #tpu.memory_space<vmem>>, vector<6x1xf32>
    %c0_9 = arith.constant 0 : index
    %c9 = arith.constant 9 : index
    %9 = vector.load %arg4[%c0_9, %c9] : memref<8x10xf32, #tpu.memory_space<vmem>>, vector<1x1xf32>
    %c0_10 = arith.constant 0 : index
    %c0_11 = arith.constant 0 : index
    %10 = vector.load %arg3[%c0_10, %c0_11] : memref<6x108xf32, #tpu.memory_space<vmem>>, vector<6x36xf32>
    %c0_12 = arith.constant 0 : index
    %c36 = arith.constant 36 : index
    %11 = vector.load %arg3[%c0_12, %c36] : memref<6x108xf32, #tpu.memory_space<vmem>>, vector<6x72xf32>
    %c0_13 = arith.constant 0 : index
    %c0_14 = arith.constant 0 : index
    %c0_15 = arith.constant 0 : index
    %12 = vector.load %arg1[%c0_13, %c0_14, %c0_15] : memref<4x4x256xf32, #tpu.memory_space<vmem>>, vector<1x4x256xf32>
    %13 = vector.shape_cast %12 : vector<1x4x256xf32> to vector<4x256xf32>
    %14 = vector.broadcast %0 : vector<4x1xf32> to vector<4x256xf32>
    %15 = arith.mulf %13, %14 : vector<4x256xf32>
    %16 = vector.broadcast %1 : vector<4x1xf32> to vector<4x256xf32>
    %17 = arith.addf %15, %16 : vector<4x256xf32>
    %cst = arith.constant 0.000000e+00 : f32
    %18 = vector.broadcast %cst : f32 to vector<4x256xf32>
    %19 = arith.maximumf %17, %18 : vector<4x256xf32>
    %c0_16 = arith.constant 0 : index
    %c0_17 = arith.constant 0 : index
    %20 = vector.load %arg5[%c0_16, %c0_17] : memref<5x256xf32, #tpu.memory_space<vmem>>, vector<1x256xf32>
    %21 = vector.broadcast %20 : vector<1x256xf32> to vector<4x256xf32>
    %22 = arith.mulf %19, %21 : vector<4x256xf32>
    %c1_18 = arith.constant 1 : index
    %c0_19 = arith.constant 0 : index
    %c0_20 = arith.constant 0 : index
    %23 = vector.load %arg1[%c1_18, %c0_19, %c0_20] : memref<4x4x256xf32, #tpu.memory_space<vmem>>, vector<1x4x256xf32>
    %24 = vector.shape_cast %23 : vector<1x4x256xf32> to vector<4x256xf32>
    %25 = vector.broadcast %0 : vector<4x1xf32> to vector<4x256xf32>
    %26 = arith.mulf %24, %25 : vector<4x256xf32>
    %27 = vector.broadcast %1 : vector<4x1xf32> to vector<4x256xf32>
    %28 = arith.addf %26, %27 : vector<4x256xf32>
    %cst_21 = arith.constant 0.000000e+00 : f32
    %29 = vector.broadcast %cst_21 : f32 to vector<4x256xf32>
    %30 = arith.maximumf %28, %29 : vector<4x256xf32>
    %c1_22 = arith.constant 1 : index
    %c0_23 = arith.constant 0 : index
    %31 = vector.load %arg5[%c1_22, %c0_23] : memref<5x256xf32, #tpu.memory_space<vmem>>, vector<1x256xf32>
    %32 = vector.broadcast %31 : vector<1x256xf32> to vector<4x256xf32>
    %33 = arith.mulf %30, %32 : vector<4x256xf32>
    %c2_24 = arith.constant 2 : index
    %c0_25 = arith.constant 0 : index
    %c0_26 = arith.constant 0 : index
    %34 = vector.load %arg1[%c2_24, %c0_25, %c0_26] : memref<4x4x256xf32, #tpu.memory_space<vmem>>, vector<1x4x256xf32>
    %35 = vector.shape_cast %34 : vector<1x4x256xf32> to vector<4x256xf32>
    %36 = vector.broadcast %0 : vector<4x1xf32> to vector<4x256xf32>
    %37 = arith.mulf %35, %36 : vector<4x256xf32>
    %38 = vector.broadcast %1 : vector<4x1xf32> to vector<4x256xf32>
    %39 = arith.addf %37, %38 : vector<4x256xf32>
    %cst_27 = arith.constant 0.000000e+00 : f32
    %40 = vector.broadcast %cst_27 : f32 to vector<4x256xf32>
    %41 = arith.maximumf %39, %40 : vector<4x256xf32>
    %c2_28 = arith.constant 2 : index
    %c0_29 = arith.constant 0 : index
    %42 = vector.load %arg5[%c2_28, %c0_29] : memref<5x256xf32, #tpu.memory_space<vmem>>, vector<1x256xf32>
    %43 = vector.broadcast %42 : vector<1x256xf32> to vector<4x256xf32>
    %44 = arith.mulf %41, %43 : vector<4x256xf32>
    %c3_30 = arith.constant 3 : index
    %c0_31 = arith.constant 0 : index
    %c0_32 = arith.constant 0 : index
    %45 = vector.load %arg1[%c3_30, %c0_31, %c0_32] : memref<4x4x256xf32, #tpu.memory_space<vmem>>, vector<1x4x256xf32>
    %46 = vector.shape_cast %45 : vector<1x4x256xf32> to vector<4x256xf32>
    %47 = vector.broadcast %0 : vector<4x1xf32> to vector<4x256xf32>
    %48 = arith.mulf %46, %47 : vector<4x256xf32>
    %49 = vector.broadcast %1 : vector<4x1xf32> to vector<4x256xf32>
    %50 = arith.addf %48, %49 : vector<4x256xf32>
    %cst_33 = arith.constant 0.000000e+00 : f32
    %51 = vector.broadcast %cst_33 : f32 to vector<4x256xf32>
    %52 = arith.maximumf %50, %51 : vector<4x256xf32>
    %c3_34 = arith.constant 3 : index
    %c0_35 = arith.constant 0 : index
    %53 = vector.load %arg5[%c3_34, %c0_35] : memref<5x256xf32, #tpu.memory_space<vmem>>, vector<1x256xf32>
    %54 = vector.broadcast %53 : vector<1x256xf32> to vector<4x256xf32>
    %55 = arith.mulf %52, %54 : vector<4x256xf32>
    %56 = vector.extract_strided_slice %22 {offsets = [0, 1], sizes = [4, 255], strides = [1, 1]} : vector<4x256xf32> to vector<4x255xf32>
    %57 = vector.extract_strided_slice %22 {offsets = [0, 0], sizes = [4, 1], strides = [1, 1]} : vector<4x256xf32> to vector<4x1xf32>
    %58 = tpu.concatenate %56, %57 in 1 : vector<4x255xf32>, vector<4x1xf32> -> vector<4x256xf32>
    %59 = vector.extract_strided_slice %22 {offsets = [0, 10], sizes = [4, 246], strides = [1, 1]} : vector<4x256xf32> to vector<4x246xf32>
    %60 = vector.extract_strided_slice %22 {offsets = [0, 0], sizes = [4, 10], strides = [1, 1]} : vector<4x256xf32> to vector<4x10xf32>
    %61 = tpu.concatenate %59, %60 in 1 : vector<4x246xf32>, vector<4x10xf32> -> vector<4x256xf32>
    %62 = vector.extract_strided_slice %22 {offsets = [0, 11], sizes = [4, 245], strides = [1, 1]} : vector<4x256xf32> to vector<4x245xf32>
    %63 = vector.extract_strided_slice %22 {offsets = [0, 0], sizes = [4, 11], strides = [1, 1]} : vector<4x256xf32> to vector<4x11xf32>
    %64 = tpu.concatenate %62, %63 in 1 : vector<4x245xf32>, vector<4x11xf32> -> vector<4x256xf32>
    %65 = vector.extract_strided_slice %33 {offsets = [0, 1], sizes = [4, 255], strides = [1, 1]} : vector<4x256xf32> to vector<4x255xf32>
    %66 = vector.extract_strided_slice %33 {offsets = [0, 0], sizes = [4, 1], strides = [1, 1]} : vector<4x256xf32> to vector<4x1xf32>
    %67 = tpu.concatenate %65, %66 in 1 : vector<4x255xf32>, vector<4x1xf32> -> vector<4x256xf32>
    %68 = vector.extract_strided_slice %33 {offsets = [0, 10], sizes = [4, 246], strides = [1, 1]} : vector<4x256xf32> to vector<4x246xf32>
    %69 = vector.extract_strided_slice %33 {offsets = [0, 0], sizes = [4, 10], strides = [1, 1]} : vector<4x256xf32> to vector<4x10xf32>
    %70 = tpu.concatenate %68, %69 in 1 : vector<4x246xf32>, vector<4x10xf32> -> vector<4x256xf32>
    %71 = vector.extract_strided_slice %33 {offsets = [0, 11], sizes = [4, 245], strides = [1, 1]} : vector<4x256xf32> to vector<4x245xf32>
    %72 = vector.extract_strided_slice %33 {offsets = [0, 0], sizes = [4, 11], strides = [1, 1]} : vector<4x256xf32> to vector<4x11xf32>
    %73 = tpu.concatenate %71, %72 in 1 : vector<4x245xf32>, vector<4x11xf32> -> vector<4x256xf32>
    %74 = vector.extract_strided_slice %44 {offsets = [0, 1], sizes = [4, 255], strides = [1, 1]} : vector<4x256xf32> to vector<4x255xf32>
    %75 = vector.extract_strided_slice %44 {offsets = [0, 0], sizes = [4, 1], strides = [1, 1]} : vector<4x256xf32> to vector<4x1xf32>
    %76 = tpu.concatenate %74, %75 in 1 : vector<4x255xf32>, vector<4x1xf32> -> vector<4x256xf32>
    %77 = vector.extract_strided_slice %44 {offsets = [0, 10], sizes = [4, 246], strides = [1, 1]} : vector<4x256xf32> to vector<4x246xf32>
    %78 = vector.extract_strided_slice %44 {offsets = [0, 0], sizes = [4, 10], strides = [1, 1]} : vector<4x256xf32> to vector<4x10xf32>
    %79 = tpu.concatenate %77, %78 in 1 : vector<4x246xf32>, vector<4x10xf32> -> vector<4x256xf32>
    %80 = vector.extract_strided_slice %44 {offsets = [0, 11], sizes = [4, 245], strides = [1, 1]} : vector<4x256xf32> to vector<4x245xf32>
    %81 = vector.extract_strided_slice %44 {offsets = [0, 0], sizes = [4, 11], strides = [1, 1]} : vector<4x256xf32> to vector<4x11xf32>
    %82 = tpu.concatenate %80, %81 in 1 : vector<4x245xf32>, vector<4x11xf32> -> vector<4x256xf32>
    %83 = vector.extract_strided_slice %55 {offsets = [0, 1], sizes = [4, 255], strides = [1, 1]} : vector<4x256xf32> to vector<4x255xf32>
    %84 = vector.extract_strided_slice %55 {offsets = [0, 0], sizes = [4, 1], strides = [1, 1]} : vector<4x256xf32> to vector<4x1xf32>
    %85 = tpu.concatenate %83, %84 in 1 : vector<4x255xf32>, vector<4x1xf32> -> vector<4x256xf32>
    %86 = vector.extract_strided_slice %55 {offsets = [0, 10], sizes = [4, 246], strides = [1, 1]} : vector<4x256xf32> to vector<4x246xf32>
    %87 = vector.extract_strided_slice %55 {offsets = [0, 0], sizes = [4, 10], strides = [1, 1]} : vector<4x256xf32> to vector<4x10xf32>
    %88 = tpu.concatenate %86, %87 in 1 : vector<4x246xf32>, vector<4x10xf32> -> vector<4x256xf32>
    %89 = vector.extract_strided_slice %55 {offsets = [0, 11], sizes = [4, 245], strides = [1, 1]} : vector<4x256xf32> to vector<4x245xf32>
    %90 = vector.extract_strided_slice %55 {offsets = [0, 0], sizes = [4, 11], strides = [1, 1]} : vector<4x256xf32> to vector<4x11xf32>
    %91 = tpu.concatenate %89, %90 in 1 : vector<4x245xf32>, vector<4x11xf32> -> vector<4x256xf32>
    %92 = tpu.concatenate %22, %33, %58, %44, %55, %76, %61, %70, %64 in 0 : vector<4x256xf32>, vector<4x256xf32>, vector<4x256xf32>, vector<4x256xf32>, vector<4x256xf32>, vector<4x256xf32>, vector<4x256xf32>, vector<4x256xf32>, vector<4x256xf32> -> vector<36x256xf32>
    %cst_36 = arith.constant dense<0.000000e+00> : vector<6x256xf32>
    %93 = tpu.matmul %10, %92, %cst_36 {dimension_numbers = #tpu.dot_dimension_numbers<[1], [0], [0], [1], [0, 0, 1, 1], [], []>} : vector<6x36xf32>, vector<36x256xf32>, vector<6x256xf32> -> vector<6x256xf32>
    %94 = tpu.concatenate %33, %58, %67, %55, %76, %85, %70, %64, %73 in 0 : vector<4x256xf32>, vector<4x256xf32>, vector<4x256xf32>, vector<4x256xf32>, vector<4x256xf32>, vector<4x256xf32>, vector<4x256xf32>, vector<4x256xf32>, vector<4x256xf32> -> vector<36x256xf32>
    %cst_37 = arith.constant dense<0.000000e+00> : vector<6x256xf32>
    %95 = tpu.matmul %10, %94, %cst_37 {dimension_numbers = #tpu.dot_dimension_numbers<[1], [0], [0], [1], [0, 0, 1, 1], [], []>} : vector<6x36xf32>, vector<36x256xf32>, vector<6x256xf32> -> vector<6x256xf32>
    %96 = arith.maximumf %93, %95 : vector<6x256xf32>
    %97 = tpu.concatenate %44, %55, %76, %61, %70, %64, %79, %88, %82 in 0 : vector<4x256xf32>, vector<4x256xf32>, vector<4x256xf32>, vector<4x256xf32>, vector<4x256xf32>, vector<4x256xf32>, vector<4x256xf32>, vector<4x256xf32>, vector<4x256xf32> -> vector<36x256xf32>
    %cst_38 = arith.constant dense<0.000000e+00> : vector<6x256xf32>
    %98 = tpu.matmul %10, %97, %cst_38 {dimension_numbers = #tpu.dot_dimension_numbers<[1], [0], [0], [1], [0, 0, 1, 1], [], []>} : vector<6x36xf32>, vector<36x256xf32>, vector<6x256xf32> -> vector<6x256xf32>
    %99 = arith.maximumf %96, %98 : vector<6x256xf32>
    %100 = tpu.concatenate %55, %76, %85, %70, %64, %73, %88, %82, %91 in 0 : vector<4x256xf32>, vector<4x256xf32>, vector<4x256xf32>, vector<4x256xf32>, vector<4x256xf32>, vector<4x256xf32>, vector<4x256xf32>, vector<4x256xf32>, vector<4x256xf32> -> vector<36x256xf32>
    %cst_39 = arith.constant dense<0.000000e+00> : vector<6x256xf32>
    %101 = tpu.matmul %10, %100, %cst_39 {dimension_numbers = #tpu.dot_dimension_numbers<[1], [0], [0], [1], [0, 0, 1, 1], [], []>} : vector<6x36xf32>, vector<36x256xf32>, vector<6x256xf32> -> vector<6x256xf32>
    %102 = arith.maximumf %99, %101 : vector<6x256xf32>
    %c0_40 = arith.constant 0 : index
    %c0_41 = arith.constant 0 : index
    %103 = vector.load %arg2[%c0_40, %c0_41] : memref<8x256xf32, #tpu.memory_space<vmem>>, vector<8x256xf32>
    %104 = vector.broadcast %2 : vector<8x1xf32> to vector<8x256xf32>
    %105 = arith.mulf %103, %104 : vector<8x256xf32>
    %106 = vector.broadcast %3 : vector<8x1xf32> to vector<8x256xf32>
    %107 = arith.addf %105, %106 : vector<8x256xf32>
    %cst_42 = arith.constant 0.000000e+00 : f32
    %108 = vector.broadcast %cst_42 : f32 to vector<8x256xf32>
    %109 = arith.maximumf %107, %108 : vector<8x256xf32>
    %c4_43 = arith.constant 4 : index
    %c0_44 = arith.constant 0 : index
    %110 = vector.load %arg5[%c4_43, %c0_44] : memref<5x256xf32, #tpu.memory_space<vmem>>, vector<1x256xf32>
    %111 = vector.broadcast %110 : vector<1x256xf32> to vector<8x256xf32>
    %112 = arith.mulf %109, %111 : vector<8x256xf32>
    %113 = vector.extract_strided_slice %112 {offsets = [0, 245], sizes = [8, 11], strides = [1, 1]} : vector<8x256xf32> to vector<8x11xf32>
    %114 = vector.extract_strided_slice %112 {offsets = [0, 0], sizes = [8, 245], strides = [1, 1]} : vector<8x256xf32> to vector<8x245xf32>
    %115 = tpu.concatenate %113, %114 in 1 : vector<8x11xf32>, vector<8x245xf32> -> vector<8x256xf32>
    %116 = vector.extract_strided_slice %112 {offsets = [0, 246], sizes = [8, 10], strides = [1, 1]} : vector<8x256xf32> to vector<8x10xf32>
    %117 = vector.extract_strided_slice %112 {offsets = [0, 0], sizes = [8, 246], strides = [1, 1]} : vector<8x256xf32> to vector<8x246xf32>
    %118 = tpu.concatenate %116, %117 in 1 : vector<8x10xf32>, vector<8x246xf32> -> vector<8x256xf32>
    %119 = vector.extract_strided_slice %112 {offsets = [0, 247], sizes = [8, 9], strides = [1, 1]} : vector<8x256xf32> to vector<8x9xf32>
    %120 = vector.extract_strided_slice %112 {offsets = [0, 0], sizes = [8, 247], strides = [1, 1]} : vector<8x256xf32> to vector<8x247xf32>
    %121 = tpu.concatenate %119, %120 in 1 : vector<8x9xf32>, vector<8x247xf32> -> vector<8x256xf32>
    %122 = vector.extract_strided_slice %112 {offsets = [0, 255], sizes = [8, 1], strides = [1, 1]} : vector<8x256xf32> to vector<8x1xf32>
    %123 = vector.extract_strided_slice %112 {offsets = [0, 0], sizes = [8, 255], strides = [1, 1]} : vector<8x256xf32> to vector<8x255xf32>
    %124 = tpu.concatenate %122, %123 in 1 : vector<8x1xf32>, vector<8x255xf32> -> vector<8x256xf32>
    %125 = vector.extract_strided_slice %112 {offsets = [0, 1], sizes = [8, 255], strides = [1, 1]} : vector<8x256xf32> to vector<8x255xf32>
    %126 = vector.extract_strided_slice %112 {offsets = [0, 0], sizes = [8, 1], strides = [1, 1]} : vector<8x256xf32> to vector<8x1xf32>
    %127 = tpu.concatenate %125, %126 in 1 : vector<8x255xf32>, vector<8x1xf32> -> vector<8x256xf32>
    %128 = vector.extract_strided_slice %112 {offsets = [0, 9], sizes = [8, 247], strides = [1, 1]} : vector<8x256xf32> to vector<8x247xf32>
    %129 = vector.extract_strided_slice %112 {offsets = [0, 0], sizes = [8, 9], strides = [1, 1]} : vector<8x256xf32> to vector<8x9xf32>
    %130 = tpu.concatenate %128, %129 in 1 : vector<8x247xf32>, vector<8x9xf32> -> vector<8x256xf32>
    %131 = vector.extract_strided_slice %112 {offsets = [0, 10], sizes = [8, 246], strides = [1, 1]} : vector<8x256xf32> to vector<8x246xf32>
    %132 = vector.extract_strided_slice %112 {offsets = [0, 0], sizes = [8, 10], strides = [1, 1]} : vector<8x256xf32> to vector<8x10xf32>
    %133 = tpu.concatenate %131, %132 in 1 : vector<8x246xf32>, vector<8x10xf32> -> vector<8x256xf32>
    %134 = vector.extract_strided_slice %112 {offsets = [0, 11], sizes = [8, 245], strides = [1, 1]} : vector<8x256xf32> to vector<8x245xf32>
    %135 = vector.extract_strided_slice %112 {offsets = [0, 0], sizes = [8, 11], strides = [1, 1]} : vector<8x256xf32> to vector<8x11xf32>
    %136 = tpu.concatenate %134, %135 in 1 : vector<8x245xf32>, vector<8x11xf32> -> vector<8x256xf32>
    %137 = tpu.concatenate %115, %118, %121, %124, %112, %127, %130, %133, %136 in 0 : vector<8x256xf32>, vector<8x256xf32>, vector<8x256xf32>, vector<8x256xf32>, vector<8x256xf32>, vector<8x256xf32>, vector<8x256xf32>, vector<8x256xf32>, vector<8x256xf32> -> vector<72x256xf32>
    %cst_45 = arith.constant dense<0.000000e+00> : vector<6x256xf32>
    %138 = tpu.matmul %11, %137, %cst_45 {dimension_numbers = #tpu.dot_dimension_numbers<[1], [0], [0], [1], [0, 0, 1, 1], [], []>} : vector<6x72xf32>, vector<72x256xf32>, vector<6x256xf32> -> vector<6x256xf32>
    %139 = arith.addf %102, %138 : vector<6x256xf32>
    %140 = arith.addf %4, %5 : vector<6x1xf32>
    %141 = vector.broadcast %140 : vector<6x1xf32> to vector<6x256xf32>
    %142 = arith.addf %139, %141 : vector<6x256xf32>
    %143 = vector.broadcast %6 : vector<6x1xf32> to vector<6x256xf32>
    %144 = arith.mulf %142, %143 : vector<6x256xf32>
    %145 = vector.broadcast %7 : vector<6x1xf32> to vector<6x256xf32>
    %146 = arith.addf %144, %145 : vector<6x256xf32>
    %cst_46 = arith.constant 0.000000e+00 : f32
    %147 = vector.broadcast %cst_46 : f32 to vector<6x256xf32>
    %148 = arith.maximumf %146, %147 : vector<6x256xf32>
    %149 = vector.broadcast %8 : vector<6x1xf32> to vector<6x256xf32>
    %150 = arith.mulf %148, %149 : vector<6x256xf32>
    %cst_47 = arith.constant dense<0.000000e+00> : vector<256xf32>
    %151 = vector.multi_reduction <add>, %150, %cst_47 [0] : vector<6x256xf32> to vector<256xf32>
    %152 = vector.shape_cast %151 : vector<256xf32> to vector<1x256xf32>
    %153 = vector.broadcast %9 : vector<1x1xf32> to vector<1x256xf32>
    %154 = arith.addf %152, %153 : vector<1x256xf32>
    %155 = vector.broadcast %154 : vector<1x256xf32> to vector<8x256xf32>
    %156 = arith.mulf %155, %103 : vector<8x256xf32>
    %c0_48 = arith.constant 0 : index
    %c0_49 = arith.constant 0 : index
    %157 = vector.load %arg6[%c0_48, %c0_49] : memref<8x256xf32, #tpu.memory_space<vmem>>, vector<8x256xf32>
    tpu.vector_store %arg6[%c0_48, %c0_49], %156 {strides = array<i32>} : memref<8x256xf32, #tpu.memory_space<vmem>>, vector<8x256xf32>,
    return
  }
  func.func @transform_0(%arg0: i32) -> (i32, i32, i32) {
    %c0_i32 = arith.constant 0 : i32
    %c0_i32_0 = arith.constant 0 : i32
    %c0_i32_1 = arith.constant 0 : i32
    return %c0_i32, %c0_i32_0, %arg0 : i32, i32, i32
  }
  func.func @transform_1(%arg0: i32) -> (i32, i32) {
    %c0_i32 = arith.constant 0 : i32
    %c0_i32_0 = arith.constant 0 : i32
    return %c0_i32, %arg0 : i32, i32
  }
  func.func @transform_2(%arg0: i32) -> (i32, i32) {
    %c0_i32 = arith.constant 0 : i32
    %c0_i32_0 = arith.constant 0 : i32
    %c0_i32_1 = arith.constant 0 : i32
    return %c0_i32, %c0_i32_0 : i32, i32
  }
  func.func @transform_3(%arg0: i32) -> (i32, i32) {
    %c0_i32 = arith.constant 0 : i32
    %c0_i32_0 = arith.constant 0 : i32
    %c0_i32_1 = arith.constant 0 : i32
    return %c0_i32, %c0_i32_0 : i32, i32
  }
  func.func @transform_4(%arg0: i32) -> (i32, i32) {
    %c0_i32 = arith.constant 0 : i32
    %c0_i32_0 = arith.constant 0 : i32
    return %c0_i32, %arg0 : i32, i32
  }
  func.func @transform_5(%arg0: i32) -> (i32, i32) {
    %c0_i32 = arith.constant 0 : i32
    %c0_i32_0 = arith.constant 0 : i32
    return %c0_i32, %arg0 : i32, i32
  }
}

</mosaic_0001>

<bundles_post_ra>
// kernel: tpu_custom_call.1
= control target key start
LH: loop header
LB: loop body
LE: loop exit
PB: predicated region body
PF: predicated region fallthrough
CT: control target
= control target key end

     0   :  { %s2430_s0 = inlined_call_operand.hbm [shape: f32[4,4,512], index: 0, kind: input, shape index: {}]   ;;  %s2431_s1 = inlined_call_operand.hbm [shape: f32[8,512], index: 1, kind: input, shape index: {}]   ;;  %s2432_s2 = inlined_call_operand.hbm [shape: f32[6,108], index: 2, kind: input, shape index: {}]   ;;  %s2433_s3 = inlined_call_operand.hbm [shape: f32[8,10], index: 3, kind: input, shape index: {}]   ;;  %s2434_s4 = inlined_call_operand.hbm [shape: f32[5,512], index: 4, kind: input, shape index: {}]   ;;  %s2435_s5 = inlined_call_operand.hbm [shape: f32[8,512], index: 5, kind: output, shape index: {}]  }
   0x1   :  { %2442 = sst [smem:[#allocation22_spill]] %s2430_s0 }
   0x2   :  { %2443 = sst [smem:[#allocation23_spill]] %s2432_s2 }
   0x3   :  { %10 = vsyncpa [#allocation3], 0 }
   0x4   :  { %12 = vsyncpa [#allocation3 + $0x1], 0 }
   0x5   :  { %13 = vsyncpa [#allocation6], 0 }
   0x6   :  { %15 = vsyncpa [#allocation6 + $0x1], 0 }
   0x7   :  { %16 = vsyncpa [#allocation9], 0 }
   0x8   :  { %17 = vsyncpa [#allocation4], 0 }
   0x9   :  { %19 = vsyncpa [#allocation4 + $0x1], 0  ;;  %s1854_s18 = smov 0   ;;  %s1856_s19 = smov 0  }
   0xa   :  { %s1858_s20 = smov 0   ;;  %s1860_s21 = smov 0  }
   0xb LB: > { %2444 = sst [smem:[#allocation18_spill]] %s1786_s18  ;;  %s1875_s22 = sadd.s32 4294967295, %s1798_s21   ;;  %s1798_s21 = sphi %s1860_s21, %s2467_s21   ;;  %s1794_s20 = sphi %s1858_s20, %s2471_s20   ;;  %s1790_s19 = sphi %s1856_s19, %s2470_s19   ;;  %s1786_s18 = sphi %s1854_s18, %s2469_s18  }
   0xc   : > { %s1300_s23 = sadd.s32 4294967294, %s1798_s21   ;;  %s1879_s24 = sadd.s32 1, %s1798_s21  }
   0xd   : > { %2445 = sst [smem:[#allocation19_spill]] %s1879_s24  ;;  %s32_s25 = sadd.s32 1, %s1794_s20 }
   0xe   : > { %s29_s26 = ssub.s32 %s1798_s21, %s1879_s24  ;;  %p39_p0 = scmp.ne.s32.totalorder %s1794_s20, %s1790_s19 }
   0xf   : > { %p30_p1 = scmp.eq.s32.totalorder %s29_s26, 0  ;;  %p40_p2 = scmp.eq.s32.totalorder %s1798_s21, 0 }
  0x10   : > { %p45_p3 = scmp.ne.s32.totalorder %s1790_s19, %s1786_s18  ;;  %p2436_p4 = scmp.eq.s32.totalorder %s1875_s22, 0 }
  0x11   : > { %s1891_s27 = scalar_select %p30_p1, %s1794_s20, %s32_s25  }
  0x12   : > { %p1893_p5 = por %p40_p2, %p39_p0  ;;  %p1899_p6 = por %p2436_p4, %p45_p3 }
  0x13   : > { %2446 = sst [smem:[#allocation20_spill]] %s1891_s27  ;;  %p163_p7 = scmp.eq.s32.totalorder %s1875_s22, 1 }
  0x14   : > { %p169_p8 = scmp.eq.s32.totalorder %s1300_s23, 1  ;;  %p1301_p9 = scmp.ge.s32.totalorder %s1798_s21, 1 }
  0x15   : > { %p176_p10 = scmp.lt.s32.totalorder %s1798_s21, 3  ;;  %p1906_p11 = por %p163_p7, %p39_p0 }
  0x16   : > { %p1910_p12 = por %p169_p8, %p45_p3  ;;  %s2453_s2 = sld [smem:[#allocation23_spill]] }
  0x17   : > { %p1914_p13 = pnand %p1301_p9, %p176_p10  ;;  %s1800_s11 = smov [#allocation7]  }
  0x18   : > { %s2450_s6 = scalar_select %p1910_p12, 1, 0 }
  0x19   : > { %p1371_p0 = pneg %p1914_p13  ;;  %s190_s12 = sshll.u32 %s1800_s11, 4  ;;  %s191_s12 = int_to_ptr.vmem [resolvable:$true] %s190_s12 }
  0x1a   : > { %2451 = sst [smem:[#allocation21_spill]] %s2450_s6  ;;  %p1394_p3 = scmp.lt.s32.totalorder %s1798_s21, 2 }
  0x1b   : > { %p1926_p2 = pnand %p1371_p0, %p2436_p4  ;;  %s2437_s16 = sand.u32 1, %s1794_s20  }
  0x1c   : > { %s188_s10 = sshll.u32 %s2453_s2, 4  ;;  %p1936_p7 = pnand %p1394_p3, %p1893_p5  ;;  %s189_s10 = int_to_ptr.hbm [resolvable:$true] %s188_s10 }
  0x1d   : > { %1374 = dma.hbm_to_vmem [thread:$0]  (!%p1926_p2), %s189_s10, 128, %s191_s12, [#allocation6]  }
  0x1e   : > { %s1305_s17 = sshll.u32 %s2437_s16, 5  ;;  %s1351_s23 = sshll.u32 %s1798_s21, 3 }
  0x1f   : > { %s2456_s0 = sld [smem:[#allocation22_spill]]  ;;  %s217_s9 = scalar_lea.vmem [#allocation2], %s1305_s17 }
  0x20   : > { %s225_s11 = sshll.u32 %s217_s9, 4  ;;  %s2457_s28 = sand.u32 1, %s1798_s21   ;;  %s226_s11 = int_to_ptr.vmem [resolvable:$true] %s225_s11 }
  0x21   : > { %s1949_s10 = scalar_lea.sflag [#allocation3], %s2457_s28  ;;  %p1600_p8 = pneg %p1936_p7 }
  0x25   : > { %s222_s8 = scalar_lea.hbm %s2456_s0, %s1351_s23  ;;  %s1603_s17 = scalar_lea.hbm %s2456_s0, 64 }
  0x26   : > { %s223_s14 = sshll.u32 %s222_s8, 4  ;;  %s224_s14 = int_to_ptr.hbm [resolvable:$true] %s223_s14 }
  0x27   : > { %s1596_s12 = sshra.s32 %s224_s14, 4  ;;  %s1597_s12 = int_to_ptr.hbm [resolvable:$true] %s1596_s12 }
  0x28   : > { %s1598_s2 = scalar_lea.hbm %s1597_s12, 32  ;;  %p1604_p0 = scmp.lt.s32.totalorder %s1597_s12, %s2456_s0 }
  0x29   : > { %p1599_p5 = scmp.ne.s32.totalorder %s1597_s12, %s1598_s2  ;;  %p1605_p3 = scmp.lt.s32.totalorder %s1603_s17, %s1598_s2 }
  0x2b   : > { %p1601_p9 = pnand %p1600_p8, %p1599_p5  ;;  %p1606_p1 = por %p1605_p3, %p1604_p0 }
  0x2d   : > { %p1602_p10 = pneg %p1601_p9 }
  0x2f   : > { %p1607_p4 = pnand %p1606_p1, %p1602_p10 }
  0x31   : > { %1610 = shalt.err (!%p1607_p4)
}
  0x32   : > { %s1801_s9 = smov 256   ;;  %s1802_s28 = smov 128  }
  0x33   : > { %s1803_s16 = smov 8   ;;  %s200_s26 = sshll.u32 %s2433_s3, 4  ;;  %s201_s26 = int_to_ptr.hbm [resolvable:$true] %s200_s26 }
  0x34   : > { %1381 = dma.hbm_to_vmem [thread:$0]  (!%p1936_p7), %s224_s14, 512, %s226_s11, %s1949_s10, %s1801_s9, %s1802_s28, %s1803_s16  }
  0x35   : > { %s1804_s2 = smov [#allocation8]   ;;  %s2458_s17 = sand.u32 1, %s1794_s20  }
  0x36   : > { %s202_s12 = sshll.u32 %s1804_s2, 4  ;;  %s1308_s8 = sshll.u32 %s2458_s17, 4  ;;  %s203_s12 = int_to_ptr.vmem [resolvable:$true] %s202_s12 }
  0x37   : > { %1377 = dma.hbm_to_vmem [thread:$0]  (!%p1926_p2), %s201_s26, 128, %s203_s12, [#allocation9]  }
  0x38   : > { %s1352_s0 = sshll.u32 %s1798_s21, 4  ;;  %s239_s14 = scalar_lea.vmem [#allocation5], %s1308_s8 }
  0x39   : > { %s244_s6 = scalar_lea.hbm %s2431_s1, %s1352_s0  ;;  %s248_s16 = sshll.u32 %s239_s14, 4  ;;  %s249_s16 = int_to_ptr.vmem [resolvable:$true] %s248_s16 }
  0x3a   : > { %s246_s18 = sshll.u32 %s244_s6, 4  ;;  %s2459_s11 = sand.u32 1, %s1798_s21   ;;  %s247_s18 = int_to_ptr.hbm [resolvable:$true] %s246_s18 }
  0x3b   : > { %s236_s9 = scalar_lea.sflag [#allocation6], %s2459_s11  ;;  %s1656_s28 = sshra.s32 %s247_s18, 4  ;;  %s1657_s28 = int_to_ptr.hbm [resolvable:$true] %s1656_s28 }
  0x3c   : > { %s1658_s25 = scalar_lea.hbm %s1657_s28, 16  ;;  %s1663_s24 = scalar_lea.hbm %s2431_s1, 32 }
  0x3d   : > { %p1659_p4 = scmp.ne.s32.totalorder %s1657_s28, %s1658_s25  ;;  %p1664_p5 = scmp.lt.s32.totalorder %s1657_s28, %s2431_s1 }
  0x3e   : > { %p1665_p9 = scmp.lt.s32.totalorder %s1663_s24, %s1658_s25 }
  0x3f   : > { %p1661_p1 = pnand %p1659_p4, %p1600_p8 }
  0x40   : > { %p1666_p10 = por %p1665_p9, %p1664_p5 }
  0x41   : > { %p1662_p2 = pneg %p1661_p1 }
  0x43   : > { %p1667_p0 = pnand %p1666_p10, %p1662_p2 }
  0x45   : > { %1670 = shalt.err (!%p1667_p0)
}
  0x46   : > { %1384 = dma.hbm_to_vmem [thread:$0]  (!%p1936_p7), %s247_s18, 256, %s249_s16, %s236_s9  }
  0x47   : > { %s264_s12 = scalar_lea.hbm %s2434_s4, %s1352_s0  ;;  %s259_s14 = scalar_lea.vmem [#allocation10], %s1308_s8 }
  0x48   : > { %s266_s17 = sshll.u32 %s264_s12, 4  ;;  %s268_s11 = sshll.u32 %s259_s14, 4  ;;  %s267_s17 = int_to_ptr.hbm [resolvable:$true] %s266_s17  ;;  %s269_s11 = int_to_ptr.vmem [resolvable:$true] %s268_s11 }
  0x49   : > { %s1686_s13 = sshra.s32 %s267_s17, 4  ;;  %s1693_s18 = scalar_lea.hbm %s2434_s4, 32  ;;  %s1687_s13 = int_to_ptr.hbm [resolvable:$true] %s1686_s13 }
  0x4a   : > { %s1688_s28 = scalar_lea.hbm %s1687_s13, 16  ;;  %p1694_p2 = scmp.lt.s32.totalorder %s1687_s13, %s2434_s4 }
  0x4b   : > { %p1689_p3 = scmp.ne.s32.totalorder %s1687_s13, %s1688_s28  ;;  %p1695_p5 = scmp.lt.s32.totalorder %s1693_s18, %s1688_s28 }
  0x4d   : > { %p1691_p4 = pnand %p1689_p3, %p1600_p8  ;;  %p1696_p9 = por %p1695_p5, %p1694_p2 }
  0x4f   : > { %p1692_p1 = pneg %p1691_p4 }
  0x51   : > { %p1697_p10 = pnand %p1696_p9, %p1692_p1 }
  0x53   : > { %1700 = shalt.err (!%p1697_p10)
}
  0x54   : > { %1387 = dma.hbm_to_vmem [thread:$0]  (!%p1936_p7), %s267_s17, 256, %s269_s11, %s1949_s10  }
  0x55   : > { %277 = sbr.rel (%p1914_p13) target bundleno = 726 (0x2d6), region = 40  ;;  %s279_s0 = sand.u32 (!%p1914_p13), 1, %s1875_s22  }
  0x56   : > { %s2008_s8 = sand.u32 (!%p1914_p13), 1, %s1790_s19   ;;  %s280_s27 = scalar_lea.sflag (!%p1914_p13), [#allocation3], %s279_s0 }
  0x57   : > { %s1315_s24 = sshll.u32 (!%p1914_p13), %s2008_s8, 5 }
  0x58   : > { %s2011_s6 = scalar_lea.vmem (!%p1914_p13), [#allocation2], %s1315_s24 }
  0x5a   : > { %1761 = dma.done.wait (%p1899_p6), %s280_s27, 512  }
  0x5b   : > { %1763 = vsyncadd (%p1899_p6), %s280_s27, 4294966784  ;;  %s2018_s7 = sshll.u32 %s2008_s8, 4  ;;  %s290_s15 = scalar_lea.sflag [#allocation6], %s279_s0 }
  0x5c   : > { %s2021_s10 = scalar_lea.vmem [#allocation5], %s2018_s7 }
  0x5d   : > { %1765 = dma.done.wait (%p1899_p6), %s290_s15, 256  }
  0x5e   : > { %1767 = vsyncadd (%p1899_p6), %s290_s15, 4294967040  ;;  %p2460_p13 = scmp.eq.s32.totalorder %s1875_s22, 0 }
  0x60   : > { %1769 = dma.done.wait (%p2460_p13), [#allocation6], 128   ;;  %p2461_p7 = pmov %p2460_p13 }
  0x62   : > { %1771 = vsyncadd (%p2461_p7), [#allocation6], 4294967168  ;;  %p2462_p8 = pmov %p2461_p7 }
  0x63   : > { %p2463_p0 = pmov %p2461_p7 }
  0x64   : > { %1773 = dma.done.wait (%p2462_p8), [#allocation9], 128  }
  0x65   : > { %1775 = vsyncadd (%p2463_p0), [#allocation9], 4294967168  ;;  %s2036_s26 = scalar_lea.vmem [#allocation10], %s2018_s7 }
  0x66   : > { %1777 = dma.done.wait (%p1899_p6), %s280_s27, 256  }
  0x67   : > { %1779 = vsyncadd (%p1899_p6), %s280_s27, 4294967040  ;;  %v1805_v0 = vmov 0   ;;  %v1806_v1 = vmov 2   ;;  %v355_v2 = vld [vmem:[#allocation8] sm:$0xf]  ;;  %v1807_v4 = vmov 1  }
  0x68   : > { %1454 = vset.pattern.permute.xlu0 %v1805_v0  ;;  %1456 = vset.pattern.permute.xlu1 %v1806_v1  ;;  %v356_v3 = vld [vmem:[#allocation8] sm:$0xff]  ;;  %v1808_v5 = vmov 3   ;;  %v1809_v6 = vmov 839922192   ;;  %v939_v12 = vld [vmem:[%s2021_s10] sm:$0xff]  ;;  %v1325_v20 = vld [vmem:[%s2011_s6 + $0x18] sm:$0xff] }
  0x69   : > { %363 = vperm.xlu0 %1454, %v355_v2   ;;  %943 = vperm.xlu1 %1456, %v356_v3   ;;  %v366_v7 = vunpack.c.l.s4 %v1809_v6  ;;  %v381_v11 = vld [vmem:[%s2036_s26] ss:$8 sm:$0x3]  ;;  %v940_v13 = vld [vmem:[%s2021_s10 + $0x8] sm:$0xff]  ;;  %vm386_vm0 = vcmask 1043456   ;;  %s1810_s29 = smov 117  }
  0x6a   : > { %v384_v15 = vperm.slane %v381_v11, 1  ;;  %v360_v16 = vld [vmem:[%s2011_s6] sm:$0xff]  ;;  %v1323_v17 = vld [vmem:[%s2011_s6 + $0x10] sm:$0xff]  ;;  %v383_v24 = vperm.slane %v381_v11, 0  ;;  %s1811_s2 = smov 118   ;;  %s1812_s12 = smov 127  }
  0x6b   : > { %v367_v10 = vunpack.c.0.s8 %v366_v7  ;;  %v1343_v21 = vld [vmem:[%s2036_s26 + $0x4] ss:$8 sm:$0x3]  ;;  %v1322_v51 = vld [vmem:[%s2036_s26 + $0x1] ss:$8 sm:$0x3] }
  0x6c   : > { %v385_v25 = vrot.slane %v384_v15, 4  ;;  %v959_v32 = vperm.slane %v1343_v21, 0  ;;  %v960_v33 = vperm.slane %v1343_v21, 1  ;;  %v1321_v54 = vld [vmem:[%s2011_s6 + $0x8] sm:$0xff]  ;;  %v399_v55 = vperm.slane %v1322_v51, 1  ;;  %s1813_s17 = smov 119  }
  0x6d   : > { %v398_v57 = vperm.slane %v1322_v51, 0  ;;  %vm474_vm1 = vcmask 957440   ;;  %vm457_vm2 = vcmask 965632   ;;  %vm440_vm3 = vcmask 1039360   ;;  %s1814_s14 = smov 10   ;;  %s1815_s11 = smov 9  }
  0x6e   : > { %v387_v37 = vsel %vm386_vm0, %v383_v24, %v385_v25  ;;  %v400_v58 = vrot.slane %v399_v55, 4  ;;  %s1816_s13 = smov 1   ;;  %s1817_s28 = smov 92   ;;  %vm668_vm4 = vcmask 293888   ;;  %vm1020_vm5 = vcmask 973824  }
  0x6f   : > { %s1818_s25 = smov 11   ;;  %vm1002_vm6 = vcmask 7168   ;;  %vm992_vm7 = vcmask 72704   ;;  %vm982_vm8 = vcmask 80896   ;;  %vm972_vm9 = vcmask 89088   ;;  %s1354_s23 = sshll.u32 %s1875_s22, 4 }
  0x70   : > { %v401_v63 = vsel %vm386_vm0, %v398_v57, %v400_v58  ;;  %vm1046_vm10 = vcmask 588800   ;;  %vm1123_vm11 = vcmask 1045504   ;;  %s1163_s9 = scalar_lea.hbm %s2435_s5, %s1354_s23  ;;  %s350_s0 = scalar_lea.vmem [#allocation11], %s2018_s7 }
  0x71   : > { %1455 = vset.pattern.permute.xlu0 %v1807_v4  ;;  %1457 = vset.pattern.permute.xlu1 %v1808_v5  ;;  %s1165_s24 = sshll.u32 %s350_s0, 4  ;;  %s1167_s27 = sshll.u32 %s1163_s9, 4  ;;  %s1166_s24 = int_to_ptr.vmem [resolvable:$true] %s1165_s24  ;;  %s1168_s27 = int_to_ptr.hbm [resolvable:$true] %s1167_s27 }
  0x72   : > { %372 = vperm.xlu0 %1455, %v355_v2   ;;  %949 = vperm.xlu1 %1457, %v356_v3   ;;  %s1152_s22 = scalar_lea.sflag [#allocation4], %s2008_s8  ;;  %s1730_s6 = sshra.s32 %s1168_s27, 4  ;;  %s1731_s6 = int_to_ptr.hbm [resolvable:$true] %s1730_s6 }
  0x73   : > { %s1732_s15 = scalar_lea.hbm %s1731_s6, 16  ;;  %p1737_p1 = scmp.lt.s32.totalorder %s1731_s6, %s2435_s5 }
  0x74   : > { %p1733_p6 = scmp.ne.s32.totalorder %s1731_s6, %s1732_s15 }
  0x76   : > { %p1734_p3 = pnand %p1733_p6, %p1906_p11 }
  0x78   : > { %p1735_p4 = pneg %p1734_p3 }
  0xdb   : > { %v364_v8 = vpop.permute.xlu0 %363  ;;  %v944_v9 = vpop.permute.xlu1 %943 }
  0xdc   : > { %v368_v14 = vperm.slane %v364_v8, %v367_v10  ;;  %v946_v18 = vmul.f32 %v944_v9, %v939_v12  ;;  %v947_v19 = vmul.f32 %v944_v9, %v940_v13  ;;  %v1324_v9 = vld [vmem:[%s2036_s26 + $0x2] ss:$8 sm:$0x3] }
  0xdd   : > { %v413_v12 = vperm.slane %v1324_v9, 1  ;;  %v412_v13 = vperm.slane %v1324_v9, 0 }
  0xde   : > { %v370_v22 = vmul.f32 %v368_v14, %v360_v16  ;;  %v406_v23 = vmul.f32 %v1323_v17, %v368_v14  ;;  %v420_v28 = vmul.f32 %v1325_v20, %v368_v14  ;;  %v392_v56 = vmul.f32 %v1321_v54, %v368_v14 }
  0xdf   : > { %v414_v14 = vrot.slane %v413_v12, 4 }
  0xe4   : > { %v373_v26 = vpop.permute.xlu0 %372  ;;  %v950_v27 = vpop.permute.xlu1 %949 }
  0xe5   : > { %v377_v29 = vperm.slane %v373_v26, %v367_v10  ;;  %v952_v30 = vadd.f32 %v950_v27, %v946_v18  ;;  %v953_v31 = vadd.f32 %v950_v27, %v947_v19  ;;  %v415_v18 = vsel %vm386_vm0, %v412_v13, %v414_v14 }
  0xe7   : > { %v379_v34 = vadd.f32 %v377_v29, %v370_v22  ;;  %v2049_v35 = vadd.f32 %v406_v23, %v377_v29  ;;  %v2051_v36 = vadd.f32 %v420_v28, %v377_v29  ;;  %v954_v38 = vmax.f32 %v952_v30, 0.0  ;;  %v1326_v28 = vld [vmem:[%s2036_s26 + $0x3] ss:$8 sm:$0x3] }
  0xe8   : > { %v955_v39 = vmax.f32 %v953_v31, 0.0  ;;  %v393_v59 = vadd.f32 %v392_v56, %v377_v29  ;;  %v427_v31 = vperm.slane %v1326_v28, 1 }
  0xe9   : > { %v380_v40 = vmax.f32 %v379_v34, 0.0  ;;  %v2054_v41 = vmul.f32 %v959_v32, %v954_v38  ;;  %v408_v17 = vmax.f32 %v2049_v35, 0.0  ;;  %v422_v38 = vmax.f32 %v2051_v36, 0.0 }
  0xea   : > { %v2056_v42 = vmul.f32 %v960_v33, %v955_v39  ;;  %v394_v62 = vmax.f32 %v393_v59, 0.0  ;;  %v426_v33 = vperm.slane %v1326_v28, 0  ;;  %v428_v34 = vrot.slane %v427_v31, 4 }
  0xeb   : > { %v2058_v43 = vmul.f32 %v387_v37, %v380_v40  ;;  %v2102_v19 = vmul.f32 %v415_v18, %v408_v17 }
  0xec   : > { %v2062_v44 = vpack.i.bf16 %v2056_v42, %v2054_v41  ;;  %v2083_v0 = vmul.f32 %v401_v63, %v394_v62  ;;  %v429_v39 = vsel %vm386_vm0, %v426_v33, %v428_v34 }
  0xed   : > { %433 = vst [vmem:[#allocation1] ss:$2 sm:$0xff] %v2058_v43 }
  0xee   : > { %1459 = vrot.lane.b32.xlu1 %v2062_v44, %s1810_s29  ;;  %1464 = vrot.lane.b32.xlu0 %v2062_v44, %s1811_s2 }
  0xf4   : > { %v2067_v45 = vld.sshfl [vmem:[#allocation1] sm:$0xff pattern:$0x75316420]  ;;  %v435_v46 = vld.sshfl [vmem:[#allocation1 + $0x8] sm:$0xff pattern:$0x75316420] }
  0xf5   : > { %444 = vst [vmem:[#allocation1] ss:$2 sm:$0xff] %v2058_v43 }
  0xfc   : > { %v445_v47 = vld.sshfl [vmem:[#allocation1] sm:$0xff pattern:$0x75316420] }
  0xfd   : > { %450 = vst [vmem:[#allocation1] ss:$2 sm:$0xff] %v2058_v43  ;;  %v1468_v48 = vpack.i.bf16 %v445_v47, %v435_v46 }
  0xff   : > { %1469 = vrot.lane.b32.xlu1 %v1468_v48, %s1812_s12 }
 0x104   : > { %v451_v49 = vld.sshfl [vmem:[#allocation1] sm:$0xff pattern:$0x75316420]  ;;  %v452_v50 = vld.sshfl [vmem:[#allocation1 + $0x8] sm:$0xff pattern:$0x75316420] }
 0x105   : > { %461 = vst [vmem:[#allocation1] ss:$2 sm:$0xff] %v2058_v43 }
 0x10c   : > { %v462_v52 = vld.sshfl [vmem:[#allocation1] sm:$0xff pattern:$0x75316420] }
 0x10d   : > { %467 = vst [vmem:[#allocation1] ss:$2 sm:$0xff] %v2058_v43  ;;  %v1473_v53 = vpack.i.bf16 %v462_v52, %v452_v50 }
 0x10f   : > { %1474 = vrot.lane.b32.xlu1 %v1473_v53, %s1811_s2 }
 0x114   : > { %v468_v60 = vld.sshfl [vmem:[#allocation1] sm:$0xff pattern:$0x75316420]  ;;  %v469_v61 = vld.sshfl [vmem:[#allocation1 + $0x8] sm:$0xff pattern:$0x75316420] }
 0x115   : > { %478 = vst [vmem:[#allocation1] ss:$2 sm:$0xff] %v2058_v43  ;;  %472 = vrot.lane.b32.xlu2 %v469_v61, %s1810_s29 }
 0x117   : > { %470 = vrot.lane.b32.xlu1 %v468_v60, %s1810_s29 }
 0x11c   : > { %v479_v1 = vld.sshfl [vmem:[#allocation1] sm:$0xff pattern:$0x75316420] }
 0x11d   : > { %485 = vst [vmem:[#allocation1] ss:$2 sm:$0xff] %v2083_v0  ;;  %480 = vrot.lane.b32.xlu0 %v479_v1, %s1810_s29 }
 0x124   : > { %v2087_v2 = vld.sshfl [vmem:[#allocation1] sm:$0xff pattern:$0x75316420]  ;;  %v487_v3 = vld.sshfl [vmem:[#allocation1 + $0x8] sm:$0xff pattern:$0x75316420] }
 0x125   : > { %495 = vst [vmem:[#allocation1] ss:$2 sm:$0xff] %v2083_v0 }
 0x12c   : > { %v496_v4 = vld.sshfl [vmem:[#allocation1] sm:$0xff pattern:$0x75316420] }
 0x12d   : > { %501 = vst [vmem:[#allocation1] ss:$2 sm:$0xff] %v2083_v0  ;;  %v1478_v5 = vpack.i.bf16 %v496_v4, %v487_v3 }
 0x12f   : > { %1479 = vrot.lane.b32.xlu1 %v1478_v5, %s1812_s12 }
 0x134   : > { %v502_v6 = vld.sshfl [vmem:[#allocation1] sm:$0xff pattern:$0x75316420]  ;;  %v503_v7 = vld.sshfl [vmem:[#allocation1 + $0x8] sm:$0xff pattern:$0x75316420] }
 0x135   : > { %511 = vst [vmem:[#allocation1] ss:$2 sm:$0xff] %v2083_v0  ;;  %v1483_v8 = vpack.i.bf16 %v503_v7, %v502_v6 }
 0x137   : > { %1484 = vrot.lane.b32.xlu2 %v1483_v8, %s1811_s2 }
 0x13c   : > { %v512_v10 = vld.sshfl [vmem:[#allocation1] sm:$0xff pattern:$0x75316420] }
 0x13d   : > { %517 = vst [vmem:[#allocation1] ss:$2 sm:$0xff] %v2083_v0  ;;  %v1488_v11 = vpack.i.bf16 %v451_v49, %v512_v10 }
 0x13f   : > { %1489 = vrot.lane.b32.xlu2 %v1488_v11, %s1811_s2 }
 0x144   : > { %v518_v15 = vld.sshfl [vmem:[#allocation1] sm:$0xff pattern:$0x75316420]  ;;  %v519_v16 = vld.sshfl [vmem:[#allocation1 + $0x8] sm:$0xff pattern:$0x75316420] }
 0x145   : > { %526 = vst [vmem:[#allocation1] ss:$2 sm:$0xff] %v2083_v0  ;;  %522 = vrot.lane.b32.xlu0 %v519_v16, %s1810_s29 }
 0x147   : > { %520 = vrot.lane.b32.xlu2 %v518_v15, %s1810_s29 }
 0x14c   : > { %v527_v20 = vld.sshfl [vmem:[#allocation1] sm:$0xff pattern:$0x75316420] }
 0x14d   : > { %533 = vst [vmem:[#allocation1] ss:$2 sm:$0xff] %v2102_v19  ;;  %528 = vrot.lane.b32.xlu1 %v527_v20, %s1810_s29 }
 0x154   : > { %v534_v21 = vld.sshfl [vmem:[#allocation1] sm:$0xff pattern:$0x75316420]  ;;  %v535_v22 = vld.sshfl [vmem:[#allocation1 + $0x8] sm:$0xff pattern:$0x75316420] }
 0x155   : > { %543 = vst [vmem:[#allocation1] ss:$2 sm:$0xff] %v2102_v19  ;;  %v1493_v23 = vpack.i.bf16 %v535_v22, %v534_v21 }
 0x157   : > { %1494 = vrot.lane.b32.xlu2 %v1493_v23, %s1812_s12 }
 0x15c   : > { %v544_v24 = vld.sshfl [vmem:[#allocation1] sm:$0xff pattern:$0x75316420] }
 0x15d   : > { %549 = vst [vmem:[#allocation1] ss:$2 sm:$0xff] %v2102_v19  ;;  %v1498_v25 = vpack.i.bf16 %v2067_v45, %v544_v24  ;;  %v2126_v45 = vmul.f32 %v429_v39, %v422_v38 }
 0x15f   : > { %1499 = vrot.lane.b32.xlu0 %v1498_v25, %s1812_s12 }
 0x160   : > { %v2116_v32 = vpop.permute.xlu1 %1459  ;;  %v2131_v36 = vpop.permute.xlu0 %1464 }
 0x164   : > { %v2111_v26 = vld.sshfl [vmem:[#allocation1] sm:$0xff pattern:$0x75316420]  ;;  %v551_v27 = vld.sshfl [vmem:[#allocation1 + $0x8] sm:$0xff pattern:$0x75316420] }
 0x165   : > { %559 = vst [vmem:[#allocation1] ss:$2 sm:$0xff] %v2102_v19 }
 0x16c   : > { %v560_v29 = vld.sshfl [vmem:[#allocation1] sm:$0xff pattern:$0x75316420] }
 0x16d   : > { %565 = vst [vmem:[#allocation1] ss:$2 sm:$0xff] %v2102_v19  ;;  %v1503_v30 = vpack.i.bf16 %v560_v29, %v551_v27  ;;  %v1548_v27 = vpack.i.bf16 %v2054_v41, %v2056_v42 }
 0x16f   : > { %1504 = vrot.lane.b32.xlu2 %v1503_v30, %s1811_s2  ;;  %v473_v51 = vpop.permute.xlu2 %472 }
 0x171   : > { %v2124_v40 = vpop.permute.xlu1 %1469 }
 0x174   : > { %v566_v35 = vld.sshfl [vmem:[#allocation1] sm:$0xff pattern:$0x75316420]  ;;  %v567_v37 = vld.sshfl [vmem:[#allocation1 + $0x8] sm:$0xff pattern:$0x75316420] }
 0x175   : > { %574 = vst [vmem:[#allocation1] ss:$2 sm:$0xff] %v2102_v19  ;;  %570 = vrot.lane.b32.xlu0 %v567_v37, %s1810_s29 }
 0x177   : > { %568 = vrot.lane.b32.xlu2 %v566_v35, %s1810_s29  ;;  %v2199_v35 = vld [vmem:[#allocation7] sm:$0x3f] }
 0x17c   : > { %v575_v46 = vld.sshfl [vmem:[#allocation1] sm:$0xff pattern:$0x75316420] }
 0x17d   : > { %581 = vst [vmem:[#allocation1] ss:$2 sm:$0xff] %v2126_v45  ;;  %576 = vrot.lane.b32.xlu1 %v575_v46, %s1810_s29 }
 0x181   : > { %v1475_v47 = vpop.permute.xlu1 %1474 }
 0x182   : > { %v1477_v3 = vunpack.i.h.bf16 %v1475_v47  ;;  %v1476_v4 = vunpack.i.l.bf16 %v1475_v47 }
 0x184   : > { %v582_v48 = vld.sshfl [vmem:[#allocation1] sm:$0xff pattern:$0x75316420]  ;;  %v583_v49 = vld.sshfl [vmem:[#allocation1 + $0x8] sm:$0xff pattern:$0x75316420]  ;;  %v2165_v15 = vsel %vm457_vm2, %v1476_v4, %v1477_v3 }
 0x185   : > { %591 = vst [vmem:[#allocation1] ss:$2 sm:$0xff] %v2126_v45  ;;  %v1508_v50 = vpack.i.bf16 %v583_v49, %v582_v48 }
 0x187   : > { %1509 = vrot.lane.b32.xlu2 %v1508_v50, %s1812_s12 }
 0x189   : > { %v471_v52 = vpop.permute.xlu1 %470 }
 0x18a   : > { %v2135_v53 = vsel %vm474_vm1, %v471_v52, %v473_v51  ;;  %v2213_v52 = vld [vmem:[#allocation8] sm:$0x3f] }
 0x18b   : > { %1327 = vmatpush.msk.msra.mxu2 %vm386_vm0, %v2135_v53 }
 0x18c   : > { %v592_v54 = vld.sshfl [vmem:[#allocation1] sm:$0xff pattern:$0x75316420] }
 0x18d   : > { %597 = vst [vmem:[#allocation1] ss:$2 sm:$0xff] %v2126_v45  ;;  %v1513_v55 = vpack.i.bf16 %v2087_v2, %v592_v54 }
 0x18f   : > { %1514 = vrot.lane.b32.xlu0 %v1513_v55, %s1812_s12  ;;  %v481_v56 = vpop.permute.xlu0 %480 }
 0x190   : > { %v2143_v57 = vsel %vm474_vm1, %v473_v51, %v481_v56 }
 0x191   : > { %v1485_v58 = vpop.permute.xlu2 %1484  ;;  %1329 = vmatpush.msk.msra.mxu3 %vm386_vm0, %v2143_v57  ;;  %v739_v9 = vrot.slane %v2143_v57, 4 }
 0x192   : > { %v1487_v61 = vunpack.i.h.bf16 %v1485_v58  ;;  %v1486_v62 = vunpack.i.l.bf16 %v1485_v58 }
 0x194   : > { %v598_v59 = vld.sshfl [vmem:[#allocation1] sm:$0xff pattern:$0x75316420]  ;;  %v599_v60 = vld.sshfl [vmem:[#allocation1 + $0x8] sm:$0xff pattern:$0x75316420]  ;;  %v2150_v1 = vsel %vm457_vm2, %v1486_v62, %v1487_v61 }
 0x195   : > { %607 = vst [vmem:[#allocation1] ss:$2 sm:$0xff] %v2126_v45  ;;  %v1518_v63 = vpack.i.bf16 %v599_v60, %v598_v59  ;;  %v656_v7 = vrot.slane %v2150_v1, 4  ;;  %v1471_v60 = vunpack.i.l.bf16 %v2124_v40 }
 0x197   : > { %1519 = vrot.lane.b32.xlu2 %v1518_v63, %s1811_s2  ;;  %v810_v63 = vrot.slane %v2165_v15, 4 }
 0x199   : > { %v1490_v2 = vpop.permute.xlu2 %1489 }
 0x19a   : > { %v1492_v5 = vunpack.i.h.bf16 %v1490_v2  ;;  %v1491_v6 = vunpack.i.l.bf16 %v1490_v2 }
 0x19c   : > { %v608_v8 = vld.sshfl [vmem:[#allocation1] sm:$0xff pattern:$0x75316420]  ;;  %v458_v10 = vsel %vm457_vm2, %v1492_v5, %v1476_v4  ;;  %v2156_v11 = vsel %vm457_vm2, %v1487_v61, %v1491_v6 }
 0x19d   : > { %613 = vst [vmem:[#allocation1] ss:$2 sm:$0xff] %v2126_v45  ;;  %v666_v12 = vsel %vm386_vm0, %v458_v10, %v656_v7  ;;  %v1523_v13 = vpack.i.bf16 %v2111_v26, %v608_v8  ;;  %v657_v14 = vrot.slane %v2156_v11, 4  ;;  %v2169_v16 = vsel %vm386_vm0, %v2156_v11, %v739_v9 }
 0x19e   : > { %689 = vmatpush.msra.mxu2 %v666_v12  ;;  %v809_v26 = vrot.slane %v458_v10, 4  ;;  %v738_v12 = vrot.slane %v2135_v53, 4 }
 0x19f   : > { %1524 = vrot.lane.b32.xlu0 %v1523_v13, %s1811_s2  ;;  %v667_v17 = vsel %vm386_vm0, %v2165_v15, %v657_v14 }
 0x1a0   : > { %709 = vmatpush.msra.mxu3 %v667_v17 }
 0x1a1   : > { %v521_v21 = vpop.permute.xlu2 %520  ;;  %v2196_v30 = vpop.permute.xlu1 %1479 }
 0x1a4   : > { %v614_v18 = vld.sshfl [vmem:[#allocation1] sm:$0xff pattern:$0x75316420]  ;;  %v615_v20 = vld.sshfl [vmem:[#allocation1 + $0x8] sm:$0xff pattern:$0x75316420] }
 0x1a5   : > { %622 = vst [vmem:[#allocation1] ss:$2 sm:$0xff] %v2126_v45  ;;  %618 = vrot.lane.b32.xlu2 %v615_v20, %s1810_s29  ;;  %616 = vrot.lane.b32.xlu1 %v614_v18, %s1810_s29  ;;  %v2252_v18 = vsel %vm386_vm0, %v2150_v1, %v738_v12 }
 0x1ac   : > { %v623_v22 = vld.sshfl [vmem:[#allocation1] sm:$0xff pattern:$0x75316420] }
 0x1ad   : > { %628 = vst [vmem:[#allocation1] ss:$2 sm:$0xff] %v2058_v43  ;;  %1534 = vrot.lane.b32.xlu2 %v2062_v44, %s1812_s12  ;;  %1529 = vrot.lane.b32.xlu1 %v2062_v44, %s1813_s17 }
 0x1ae   : > { %624 = vrot.lane.b32.xlu0 %v623_v22, %s1810_s29  ;;  %s1736_s29 = scalar_lea.hbm %s2435_s5, 32 }
 0x1af   : > { %p1738_p2 = scmp.lt.s32.totalorder %s1736_s29, %s1732_s15 }
 0x1b1   : > { %v1495_v23 = vpop.permute.xlu2 %1494  ;;  %p1739_p5 = por %p1738_p2, %p1737_p1 }
 0x1b2   : > { %v1497_v24 = vunpack.i.h.bf16 %v1495_v23  ;;  %v1496_v25 = vunpack.i.l.bf16 %v1495_v23 }
 0x1b3   : > { %p1740_p9 = pnand %p1739_p5, %p1735_p4 }
 0x1b4   : > { %v629_v28 = vld.sshfl [vmem:[#allocation1] sm:$0xff pattern:$0x75316420]  ;;  %v2186_v29 = vld.sshfl [vmem:[#allocation1 + $0x8] sm:$0xff pattern:$0x75316420]  ;;  %v2189_v43 = vsel %vm440_vm3, %v1496_v25, %v1497_v24 }
 0x1b5   : > { %634 = vst [vmem:[#allocation1 + $0x1] ss:$2 sm:$0xff] %v2083_v0  ;;  %1549 = vrot.lane.b32.xlu2 %v1548_v27, %s1814_s14  ;;  %1544 = vrot.lane.b32.xlu1 %v1548_v27, %s1815_s11  ;;  %v2194_v44 = vsel %vm386_vm0, %v2189_v43, %v809_v26  ;;  %v651_v54 = vrot.slane %v2189_v43, 4 }
 0x1b6   : > { %1539 = vrot.lane.b32.xlu0 %v1548_v27, %s1816_s13 }
 0x1b7   : > { %v523_v31 = vpop.permute.xlu0 %522 }
 0x1b8   : > { %v524_v33 = vsel %vm474_vm1, %v521_v21, %v523_v31 }
 0x1b9   : > { %v876_v34 = vrot.slane %v524_v33, 4 }
 0x1bb   : > { %v2203_v37 = vsel %vm386_vm0, %v2135_v53, %v876_v34 }
 0x1bc   : > { %v635_v38 = vld.sshfl [vmem:[#allocation1] sm:$0xff pattern:$0x75316420]  ;;  %v636_v39 = vld.sshfl [vmem:[#allocation1 + $0x8] sm:$0xff pattern:$0x75316420] }
 0x1bd   : > { %640 = vst [vmem:[#allocation1 + $0x1] ss:$2 sm:$0xff] %v2102_v19  ;;  %1044 = vrot.lane.b32.xlu1 %v2199_v35, %s1817_s28  ;;  %1092 = vrot.lane.b32.xlu2 %v2213_v52, %s1812_s12  ;;  %v660_v10 = vsel %vm386_vm0, %v629_v28, %v635_v38  ;;  %v661_v20 = vsel %vm386_vm0, %v2186_v29, %v636_v39 }
 0x1be   : > { %1554 = vrot.lane.b32.xlu0 %v1548_v27, %s1818_s25 }
 0x1bf   : > { %v529_v46 = vpop.permute.xlu1 %528 }
 0x1c0   : > { %v531_v47 = vsel %vm474_vm1, %v523_v31, %v529_v46 }
 0x1c1   : > { %v877_v48 = vrot.slane %v531_v47, 4 }
 0x1c3   : > { %v2210_v49 = vsel %vm386_vm0, %v2143_v57, %v877_v48  ;;  %v1481_v48 = vunpack.i.l.bf16 %v2196_v30 }
 0x1c4   : > { %v641_v50 = vld.sshfl [vmem:[#allocation1] sm:$0xff pattern:$0x75316420]  ;;  %v642_v51 = vld.sshfl [vmem:[#allocation1 + $0x8] sm:$0xff pattern:$0x75316420] }
 0x1c5   : > { %645 = vst [vmem:[#allocation1] ss:$2 sm:$0xff] %v2126_v45 }
 0x1c9   : > { %v2222_v58 = vpop.permute.xlu2 %1504 }
 0x1cc   : > { %v646_v55 = vld.sshfl [vmem:[#allocation1] sm:$0xff pattern:$0x75316420]  ;;  %v647_v56 = vld.sshfl [vmem:[#allocation1 + $0x8] sm:$0xff pattern:$0x75316420] }
 0x1cd   : > { %717 = vst [vmem:[#allocation1] ss:$2 sm:$0xff] %v2083_v0  ;;  %v664_v57 = vsel %vm386_vm0, %v646_v55, %v651_v54  ;;  %v1472_v0 = vunpack.i.h.bf16 %v2124_v40  ;;  %v1482_v55 = vunpack.i.h.bf16 %v2196_v30 }
 0x1ce   : > { %690 = vmatpush.msra.mxu2 %v664_v57 }
 0x1cf   : > { %v449_v13 = vsel %vm440_vm3, %v1471_v60, %v1472_v0  ;;  %v500_v30 = vsel %vm440_vm3, %v1481_v48, %v1482_v55  ;;  %v1467_v55 = vunpack.i.h.bf16 %v2131_v36 }
 0x1d0   : > { %v663_v17 = vsel %vm386_vm0, %v449_v13, %v642_v51  ;;  %v724_v0 = vrot.slane %v449_v13, 4 }
 0x1d1   : > { %v1500_v59 = vpop.permute.xlu0 %1499  ;;  %v569_v15 = vpop.permute.xlu2 %568 }
 0x1d2   : > { %v1502_v61 = vunpack.i.h.bf16 %v1500_v59  ;;  %v1501_v62 = vunpack.i.l.bf16 %v1500_v59 }
 0x1d4   : > { %v2226_v2 = vld.sshfl [vmem:[#allocation1] sm:$0xff pattern:$0x75316420]  ;;  %v2228_v3 = vld.sshfl [vmem:[#allocation1 + $0x8] sm:$0xff pattern:$0x75316420]  ;;  %v2232_v4 = vsel %vm440_vm3, %v1497_v24, %v1501_v62  ;;  %v441_v5 = vsel %vm440_vm3, %v1502_v61, %v1471_v60 }
 0x1d5   : > { %728 = vst [vmem:[#allocation1 + $0x1] ss:$2 sm:$0xff] %v2126_v45  ;;  %v662_v6 = vsel %vm386_vm0, %v441_v5, %v641_v50  ;;  %v652_v8 = vrot.slane %v2232_v4, 4  ;;  %v2240_v9 = vsel %vm386_vm0, %v2232_v4, %v810_v63  ;;  %v723_v51 = vrot.slane %v441_v5, 4 }
 0x1d6   : > { %691 = vmatpush.msra.mxu2 %v662_v6  ;;  %v743_v6 = vsel %vm386_vm0, %v2228_v3, %v724_v0 }
 0x1d7   : > { %v665_v40 = vsel %vm386_vm0, %v647_v56, %v652_v8  ;;  %v742_v62 = vsel %vm386_vm0, %v2226_v2, %v723_v51  ;;  %v1821_v51 = vmov 7  }
 0x1d8   : > { %692 = vmatpush.msra.mxu2 %v660_v10  ;;  %710 = vmatpush.msra.mxu3 %v665_v40 }
 0x1d9   : > { %1328 = vmatmul.msk.f32.vlgmr.msra.gmra.mxu2 %vm668_vm4, %v2199_v35  ;;  %1560 = vset.pattern.permute.xlu2 %v1821_v51 }
 0x1da   : > { %1331 = vmatpush.msk.msrb.mxu2 %vm386_vm0, %v524_v33  ;;  %711 = vmatpush.msra.mxu3 %v663_v17  ;;  %v1506_v17 = vunpack.i.l.bf16 %v2222_v58 }
 0x1db   : > { %1110 = vperm.xlu2 %1560, %v2213_v52  }
 0x1dc   : > { %767 = vmatpush.msrb.mxu2 %v2252_v18  ;;  %v729_v53 = vld.sshfl [vmem:[#allocation1] sm:$0xff pattern:$0x75316420]  ;;  %v730_v21 = vld.sshfl [vmem:[#allocation1 + $0x8] sm:$0xff pattern:$0x75316420]  ;;  %712 = vmatpush.msra.mxu3 %v661_v20 }
 0x1dd   : > { %797 = vst [vmem:[#allocation1] ss:$2 sm:$0xff] %v2102_v19  ;;  %1330 = vmatmul.msk.f32.vlgmr.msra.gmra.mxu3 %vm668_vm4, %v2199_v35  ;;  %v745_v5 = vsel %vm386_vm0, %v500_v30, %v730_v21 }
 0x1de   : > { %1333 = vmatpush.msk.msrb.mxu3 %vm386_vm0, %v531_v47 }
 0x1e0   : > { %787 = vmatpush.msrb.mxu3 %v2169_v16 }
 0x1e1   : > { %v1510_v22 = vpop.permute.xlu2 %1509 }
 0x1e2   : > { %v1512_v23 = vunpack.i.h.bf16 %v1510_v22  ;;  %v1511_v24 = vunpack.i.l.bf16 %v1510_v22 }
 0x1e4   : > { %v2260_v25 = vld.sshfl [vmem:[#allocation1 + $0x8] sm:$0xff pattern:$0x75316420]  ;;  %v2263_v26 = vsel %vm440_vm3, %v1511_v24, %v1512_v23  ;;  %v2265_v27 = vld.sshfl [vmem:[#allocation1] sm:$0xff pattern:$0x75316420] }
 0x1e5   : > { %v734_v28 = vrot.slane %v2263_v26, 4  ;;  %803 = vst [vmem:[#allocation1 + $0x1] ss:$2 sm:$0xff] %v2126_v45 }
 0x1e7   : > { %v571_v29 = vpop.permute.xlu0 %570  ;;  %v746_v19 = vsel %vm386_vm0, %v2189_v43, %v734_v28 }
 0x1e8   : > { %768 = vmatpush.msrb.mxu2 %v746_v19  ;;  %v2272_v31 = vsel %vm474_vm1, %v569_v15, %v571_v29  ;;  %v1507_v15 = vunpack.i.h.bf16 %v2222_v58 }
 0x1e9   : > { %1335 = vmatpush.msk.msra.mxu0 %vm386_vm0, %v2272_v31 }
 0x1ea   : > { %v564_v28 = vsel %vm457_vm2, %v1506_v17, %v1507_v15 }
 0x1ec   : > { %v2276_v33 = vld.sshfl [vmem:[#allocation1] sm:$0xff pattern:$0x75316420]  ;;  %v2278_v34 = vld.sshfl [vmem:[#allocation1 + $0x8] sm:$0xff pattern:$0x75316420] }
 0x1ed   : > { %871 = vst [vmem:[#allocation1] ss:$2 sm:$0xff] %v2126_v45 }
 0x1ef   : > { %v577_v38 = vpop.permute.xlu1 %576 }
 0x1f0   : > { %v2282_v39 = vsel %vm474_vm1, %v571_v29, %v577_v38  ;;  %v1819_v29 = vmov 6   ;;  %v1820_v38 = vmov 4  }
 0x1f1   : > { %1337 = vmatpush.msk.msra.mxu1 %vm386_vm0, %v2282_v39  ;;  %v1520_v46 = vpop.permute.xlu2 %1519  ;;  %1559 = vset.pattern.permute.xlu1 %v1819_v29 }
 0x1f2   : > { %v1522_v10 = vunpack.i.h.bf16 %v1520_v46  ;;  %v1521_v40 = vunpack.i.l.bf16 %v1520_v46  ;;  %1558 = vset.pattern.permute.xlu0 %v1820_v38  ;;  %1104 = vperm.xlu1 %1559, %v2213_v52   ;;  %v1462_v46 = vunpack.i.h.bf16 %v2116_v32 }
 0x1f4   : > { %v604_v12 = vsel %vm457_vm2, %v1521_v40, %v1522_v10 }
 0x1f5   : > { %v814_v21 = vrot.slane %v604_v12, 4 }
 0x1ff   : > { %v2292_v56 = vpop.permute.xlu2 %618 }
 0x201   : > { %v1515_v47 = vpop.permute.xlu0 %1514 }
 0x202   : > { %v1517_v50 = vunpack.i.h.bf16 %v1515_v47  ;;  %v1516_v45 = vunpack.i.l.bf16 %v1515_v47  ;;  %v1461_v47 = vunpack.i.l.bf16 %v2116_v32 }
 0x204   : > { %v492_v57 = vsel %vm440_vm3, %v1517_v50, %v1481_v48  ;;  %v2296_v59 = vsel %vm440_vm3, %v1512_v23, %v1516_v45  ;;  %v880_v48 = vrot.slane %v2272_v31, 4  ;;  %v1039_v31 = vsel %vm474_vm1, %v1461_v47, %v1462_v46 }
 0x205   : > { %v744_v60 = vsel %vm386_vm0, %v492_v57, %v729_v53  ;;  %v735_v61 = vrot.slane %v2296_v59, 4  ;;  %v1466_v57 = vunpack.i.l.bf16 %v2131_v36  ;;  %v819_v36 = vsel %vm386_vm0, %v2260_v25, %v2278_v34 }
 0x206   : > { %769 = vmatpush.msrb.mxu2 %v744_v60  ;;  %v890_v32 = vsel %vm386_vm0, %v604_v12, %v880_v48  ;;  %v872_v60 = vld.sshfl [vmem:[#allocation1] sm:$0xff pattern:$0x75316420]  ;;  %v887_v40 = vsel %vm386_vm0, %v2296_v59, %v657_v14 }
 0x207   : > { %v747_v63 = vsel %vm386_vm0, %v2232_v4, %v735_v61  ;;  %v2312_v2 = vpop.permute.xlu2 %1534  ;;  %v884_v25 = vsel %vm386_vm0, %v872_v60, %v651_v54  ;;  %v1822_v61 = vmov 8   ;;  %v1034_v43 = vsel %vm457_vm2, %v1467_v55, %v1466_v57 }
 0x208   : > { %770 = vmatpush.msrb.mxu2 %v742_v62  ;;  %788 = vmatpush.msrb.mxu3 %v747_v63  ;;  %v1537_v1 = vunpack.i.h.bf16 %v2312_v2  ;;  %v881_v62 = vrot.slane %v2282_v39, 4 }
 0x209   : > { %1332 = vmatmul.msk.f32.vlgmr.msrb.gmra.mxu2 %vm668_vm4, %v2199_v35  ;;  %1561 = vset.pattern.permute.xlu1 %v1822_v61 }
 0x20a   : > { %789 = vmatpush.msrb.mxu3 %v745_v5  ;;  %1118 = vperm.xlu1 %1561, %v2213_v52  }
 0x20c   : > { %790 = vmatpush.msrb.mxu3 %v743_v6  ;;  %v873_v6 = vld.sshfl [vmem:[#allocation1 + $0x8] sm:$0xff pattern:$0x75316420] }
 0x20d   : > { %1334 = vmatmul.msk.f32.vlgmr.msrb.gmra.mxu3 %vm668_vm4, %v2199_v35 }
 0x20f   : > { %v2329_v50 = vpop.permute.xlu2 %1549 }
 0x210   : > { %v1551_v14 = vunpack.i.l.bf16 %v2329_v50 }
 0x211   : > { %v1525_v13 = vpop.permute.xlu0 %1524 }
 0x212   : > { %v1527_v20 = vunpack.i.h.bf16 %v1525_v13  ;;  %v1526_v53 = vunpack.i.l.bf16 %v1525_v13 }
 0x214   : > { %v556_v3 = vsel %vm457_vm2, %v1527_v20, %v1506_v17  ;;  %v2319_v22 = vsel %vm457_vm2, %v1522_v10, %v1526_v53  ;;  %v1823_v20 = vmov 9  }
 0x215   : > { %v822_v23 = vsel %vm386_vm0, %v556_v3, %v814_v21  ;;  %v815_v24 = vrot.slane %v2319_v22, 4  ;;  %v891_v39 = vsel %vm386_vm0, %v2319_v22, %v881_v62  ;;  %1562 = vset.pattern.permute.xlu2 %v1823_v20 }
 0x216   : > { %841 = vmatpush.msra.mxu0 %v822_v23 }
 0x217   : > { %v617_v19 = vpop.permute.xlu1 %616  ;;  %v823_v58 = vsel %vm386_vm0, %v564_v28, %v815_v24  ;;  %v1093_v34 = vpop.permute.xlu2 %1092 }
 0x218   : > { %v620_v45 = vsel %vm474_vm1, %v617_v19, %v2292_v56  ;;  %842 = vmatpush.msra.mxu0 %v2252_v18  ;;  %861 = vmatpush.msra.mxu1 %v823_v58  ;;  %v818_v18 = vsel %vm386_vm0, %v2265_v27, %v2276_v33  ;;  %v1536_v27 = vunpack.i.l.bf16 %v2312_v2  ;;  %v1095_v54 = vadd.f32 %v1093_v34, %v2213_v52  ;;  %v358_v2 = vld [vmem:[#allocation8] sm:$0x1] }
 0x219   : > { %1339 = vmatpush.msk.msra.mxu2 %vm386_vm0, %v620_v45  ;;  %1140 = vperm.xlu2 %1562, %v358_v2  }
 0x21a   : > { %843 = vmatpush.msra.mxu0 %v2194_v44  ;;  %862 = vmatpush.msra.mxu1 %v2169_v16  ;;  %v886_v16 = vsel %vm386_vm0, %v2263_v26, %v656_v7  ;;  %v1030_v44 = vsel %vm457_vm2, %v1466_v57, %v1467_v55  ;;  %v1015_v5 = vsel %vm440_vm3, %v1537_v1, %v1536_v27 }
 0x21b   : > { %909 = vmatpush.msra.mxu2 %v890_v32  ;;  %1098 = vperm.xlu0 %1558, %v1095_v54  }
 0x21c   : > { %844 = vmatpush.msra.mxu0 %v818_v18  ;;  %863 = vmatpush.msra.mxu1 %v2240_v9 }
 0x21d   : > { %910 = vmatpush.msra.mxu2 %v2203_v37  ;;  %1336 = vmatmul.msk.f32.vlgmr.msra.gmra.mxu0 %vm668_vm4, %v2199_v35  ;;  %v1043_v37 = vsel %vm474_vm1, %v1462_v46, %v1461_v47 }
 0x21e   : > { %1056 = vmatpush.msrb.mxu0 %v1039_v31  ;;  %864 = vmatpush.msra.mxu1 %v819_v36 }
 0x21f   : > { %v1530_v9 = vpop.permute.xlu1 %1529  ;;  %911 = vmatpush.msra.mxu2 %v886_v16  ;;  %1338 = vmatmul.msk.f32.vlgmr.msra.gmra.mxu1 %vm668_vm4, %v2199_v35 }
 0x220   : > { %1057 = vmatpush.msrb.mxu0 %v1030_v44  ;;  %v1532_v7 = vunpack.i.h.bf16 %v1530_v9  ;;  %v1531_v26 = vunpack.i.l.bf16 %v1530_v9  ;;  %v625_v33 = vpop.permute.xlu0 %624  ;;  %1076 = vmatpush.msrb.mxu1 %v1043_v37 }
 0x221   : > { %v627_v63 = vsel %vm474_vm1, %v2292_v56, %v625_v33  ;;  %912 = vmatpush.msra.mxu2 %v884_v25  ;;  %v1011_v56 = vsel %vm440_vm3, %v1536_v27, %v1537_v1 }
 0x222   : > { %1341 = vmatpush.msk.msra.mxu3 %vm386_vm0, %v627_v63  ;;  %1077 = vmatpush.msrb.mxu1 %v1034_v43  ;;  %v1021_v30 = vsel %vm1020_vm5, %v1531_v26, %v1532_v7  ;;  %v1025_v0 = vsel %vm1020_vm5, %v1532_v7, %v1531_v26 }
 0x223   : > { %1340 = vmatmul.msk.f32.vlgmr.msra.gmra.mxu2 %vm668_vm4, %v2199_v35  ;;  %1058 = vmatpush.msrb.mxu0 %v1021_v30 }
 0x224   : > { %929 = vmatpush.msra.mxu3 %v891_v39  ;;  %1078 = vmatpush.msrb.mxu1 %v1025_v0 }
 0x225   : > { %1059 = vmatpush.msrb.mxu0 %v1011_v56  ;;  %1563 = vset.pattern.permute.xlu0 %v1823_v20 }
 0x226   : > { %930 = vmatpush.msra.mxu3 %v2210_v49  ;;  %1079 = vmatpush.msrb.mxu1 %v1015_v5  ;;  %v885_v49 = vsel %vm386_vm0, %v873_v6, %v652_v8 }
 0x227   : > { %v1545_v10 = vpop.permute.xlu1 %1544  ;;  %1060 = vmatpush.msrb.mxu0 %v2054_v41  ;;  %v1552_v41 = vunpack.i.h.bf16 %v2329_v50 }
 0x228   : > { %v1540_v12 = vpop.permute.xlu0 %1539  ;;  %931 = vmatpush.msra.mxu3 %v887_v40  ;;  %1080 = vmatpush.msrb.mxu1 %v2056_v42  ;;  %v1547_v13 = vunpack.i.h.bf16 %v1545_v10  ;;  %v1546_v15 = vunpack.i.l.bf16 %v1545_v10 }
 0x229   : > { %v1542_v11 = vunpack.i.h.bf16 %v1540_v12  ;;  %v1541_v17 = vunpack.i.l.bf16 %v1540_v12  ;;  %v986_v59 = vsel %vm982_vm8, %v1551_v14, %v1552_v41  ;;  %v983_v53 = vsel %vm982_vm8, %v1552_v41, %v1551_v14  ;;  %v1564_v14 = vld [vmem:[%s2021_s10] sm:$0xff] }
 0x22a   : > { %932 = vmatpush.msra.mxu3 %v885_v49  ;;  %v996_v4 = vsel %vm992_vm7, %v1546_v15, %v1547_v13  ;;  %v993_v8 = vsel %vm992_vm7, %v1547_v13, %v1546_v15 }
 0x22b   : > { %1342 = vmatmul.msk.f32.vlgmr.msra.gmra.mxu3 %vm668_vm4, %v2199_v35  ;;  %v1006_v42 = vsel %vm1002_vm6, %v1541_v17, %v1542_v11  ;;  %v1003_v52 = vsel %vm1002_vm6, %v1542_v11, %v1541_v17 }
 0x22c   : > { %1061 = vmatpush.msrb.mxu0 %v1006_v42  ;;  %1081 = vmatpush.msrb.mxu1 %v1003_v52  ;;  %v1565_v52 = vld [vmem:[%s2021_s10 + $0x8] sm:$0xff] }
 0x22e   : > { %1062 = vmatpush.msrb.mxu0 %v996_v4  ;;  %1082 = vmatpush.msrb.mxu1 %v993_v8 }
 0x22f   : > { %v1045_v23 = vpop.permute.xlu1 %1044 }
 0x230   : > { %v1555_v21 = vpop.permute.xlu0 %1554  ;;  %1063 = vmatpush.msrb.mxu0 %v986_v59  ;;  %1083 = vmatpush.msrb.mxu1 %v983_v53 }
 0x231   : > { %v1557_v3 = vunpack.i.h.bf16 %v1555_v21  ;;  %v1556_v22 = vunpack.i.l.bf16 %v1555_v21 }
 0x233   : > { %v976_v35 = vsel %vm972_vm9, %v1556_v22, %v1557_v3  ;;  %v973_v24 = vsel %vm972_vm9, %v1557_v3, %v1556_v22 }
 0x234   : > { %1064 = vmatpush.msrb.mxu0 %v976_v35  ;;  %1084 = vmatpush.msrb.mxu1 %v973_v24 }
 0x235   : > { %1344 = vmatmul.msk.f32.vlgmr.msrb.gmra.mxu0 %vm1046_vm10, %v1045_v23  ;;  %1345 = vmatmul.msk.f32.vlgmr.msrb.gmra.mxu1 %vm1046_vm10, %v1045_v23  ;;  %v1111_v25 = vpop.permute.xlu2 %1110 }
 0x25c   : > { %v694_v28 = vpop.f32.mrf.mxu2 }
 0x260   : > { %v714_v29 = vpop.f32.mrf.mxu3 }
 0x264   : > { %v1105_v57 = vpop.permute.xlu1 %1104 }
 0x273   : > { %v1141_v49 = vpop.permute.xlu2 %1140 }
 0x27c   : > { %v1119_v33 = vpop.permute.xlu1 %1118 }
 0x28c   : > { %v772_v19 = vpop.f32.mrf.mxu2 }
 0x28d   : > { %v795_v47 = vmax.f32 %v694_v28, %v772_v19  ;;  %v1099_v31 = vpop.permute.xlu0 %1098 }
 0x290   : > { %v792_v58 = vpop.f32.mrf.mxu3 }
 0x291   : > { %v796_v48 = vmax.f32 %v714_v29, %v792_v58 }
 0x29a   : > { %v846_v38 = vpop.f32.mrf.mxu0 }
 0x29b   : > { %v869_v51 = vmax.f32 %v795_v47, %v846_v38 }
 0x29c   : > { %v866_v46 = vpop.f32.mrf.mxu1 }
 0x29d   : > { %v870_v55 = vmax.f32 %v796_v48, %v866_v46 }
 0x2a6   : > { %v914_v50 = vpop.f32.mrf.mxu2 }
 0x2a7   : > { %v937_v32 = vmax.f32 %v869_v51, %v914_v50 }
 0x2ae   : > { %v934_v45 = vpop.f32.mrf.mxu3 }
 0x2af   : > { %v938_v18 = vmax.f32 %v870_v55, %v934_v45 }
 0x2b2   : > { %v1066_v60 = vpop.f32.mrf.mxu0  ;;  %v1086_v36 = vpop.f32.mrf.mxu1 }
 0x2b3   : > { %v1089_v16 = vadd.f32 %v1066_v60, %v937_v32  ;;  %v1090_v44 = vadd.f32 %v1086_v36, %v938_v18 }
 0x2b5   : > { %v1101_v9 = vadd.f32 %v1099_v31, %v1089_v16  ;;  %v1102_v37 = vadd.f32 %v1099_v31, %v1090_v44 }
 0x2b7   : > { %v1107_v1 = vmul.f32 %v1105_v57, %v1101_v9  ;;  %v1108_v27 = vmul.f32 %v1105_v57, %v1102_v37 }
 0x2b9   : > { %v1113_v7 = vadd.f32 %v1111_v25, %v1107_v1  ;;  %v1114_v26 = vadd.f32 %v1111_v25, %v1108_v27 }
 0x2bb   : > { %v1115_v34 = vmax.f32 %v1113_v7, 0.0  ;;  %v1116_v61 = vmax.f32 %v1114_v26, 0.0 }
 0x2bd   : > { %v1121_v62 = vmul.f32 %v1119_v33, %v1115_v34  ;;  %v1122_v63 = vmul.f32 %v1119_v33, %v1116_v61 }
 0x2bf   : > { %v1124_v43 = vsel %vm1123_vm11, %v1121_v62, 0.0  ;;  %v1131_v54 = vsel %vm1123_vm11, %v1122_v63, 0.0 }
 0x2c0   : > { %v1125_v30 = vrot.slane %v1124_v43, 4  ;;  %v1132_v0 = vrot.slane %v1131_v54, 4 }
 0x2c2   : > { %v1126_v39 = vadd.f32 %v1125_v30, %v1124_v43  ;;  %v1133_v56 = vadd.f32 %v1132_v0, %v1131_v54 }
 0x2c4   : > { %v1127_v5 = vrot.slane %v1126_v39, 2  ;;  %v1134_v6 = vrot.slane %v1133_v56, 2 }
 0x2c6   : > { %v1128_v10 = vadd.f32 %v1127_v5, %v1126_v39  ;;  %v1135_v40 = vadd.f32 %v1134_v6, %v1133_v56 }
 0x2c8   : > { %v1129_v2 = vrot.slane %v1128_v10, 1  ;;  %v1136_v12 = vrot.slane %v1135_v40, 1 }
 0x2ca   : > { %v1130_v13 = vadd.f32 %v1129_v2, %v1128_v10  ;;  %v1137_v15 = vadd.f32 %v1136_v12, %v1135_v40 }
 0x2cc   : > { %v1143_v11 = vadd.f32 %v1141_v49, %v1130_v13  ;;  %v1144_v17 = vadd.f32 %v1141_v49, %v1137_v15 }
 0x2ce   : > { %v1145_v20 = vperm.slane %v1143_v11, 0  ;;  %v1146_v41 = vperm.slane %v1144_v17, 0 }
 0x2d0   : > { %v1147_v42 = vmul.f32 %v1564_v14, %v1145_v20  ;;  %v1148_v4 = vmul.f32 %v1565_v52, %v1146_v41 }
 0x2d2   : > { %1149 = vst [vmem:[%s350_s0] sm:$0xff] %v1147_v42 }
 0x2d3   : > { %1150 = vst [vmem:[%s350_s0 + $0x8] sm:$0xff] %v1148_v4 }
 0x2d4   : > { %1743 = shalt.err (!%p1740_p9)
}
 0x2d5   : > { %1369 = dma.vmem_to_hbm [thread:$0]  (%p1906_p11), %s1166_s24, 256, %s1168_s27, %s1152_s22  }
 0x2d6 PF: > { %s2464_s8 = sld [smem:[#allocation18_spill]]  ;;  %p2466_p10 = scmp.ge.s32.totalorder %s1798_s21, 2 }
 0x2d8   : > { %p1389_p13 = pnand %p2466_p10, %p1910_p12 }
 0x2da   : > { %p1390_p7 = pneg %p1389_p13 }
 0x2dc   : > { %s1179_s17 = sand.u32 1, %s2464_s8  }
 0x2dd   : > { %s1180_s14 = scalar_lea.sflag [#allocation4], %s1179_s17 }
 0x2de   : > { %1781 = dma.done.wait (%p1390_p7), %s1180_s14, 256  }
 0x2df   : > { %1783 = vsyncadd (%p1390_p7), %s1180_s14, 4294967040  ;;  %s2467_s21 = sld [smem:[#allocation19_spill]]  ;;  %s2469_s18 = smov %s1790_s19 }
 0x2e0   : > { %s2468_s11 = sld [smem:[#allocation20_spill]]  ;;  %s2470_s19 = smov %s1794_s20 }
 0x2e5   : > { %p22_p8 = scmp.ge.s32.totalorder %s2467_s21, 4  }
 0x2e6   : > { %s2471_s20 = smov %s2468_s11 }
 0x2e7   :  { %24 = sbr.rel (!%p22_p8) target bundleno = 11 (0xb), region = 128 }
 0x2ec   :  { %1186 = vsyncpa [#allocation3], 1 }
 0x2ed   :  { %1188 = vsyncpa [#allocation3 + $0x1], 1 }
 0x2ee   :  { %1189 = vsyncpa [#allocation6], 1 }
 0x2ef   :  { %1191 = vsyncpa [#allocation6 + $0x1], 1 }
 0x2f0   :  { %1192 = vsyncpa [#allocation9], 1 }
 0x2f1   :  { %1193 = vsyncpa [#allocation4], 1 }
 0x2f2   :  { %1195 = vsyncpa [#allocation4 + $0x1], 1 }

</bundles_post_ra>
